<compile_context>
chip_gen: v6e
topology: v6e:2x2x1
jax: 0.10.0
libtpu: 0.0.40
codegen_flags: <defaults>
</compile_context>

<pallas_src>
import functools

import jax
import jax.numpy as jnp
from jax.experimental import pallas as pl
from jax.experimental.pallas import tpu as pltpu


# --------------------------------------------------------------------------- #
# Fully fused path: gather + ReLU + GRU + out-Linear in one kernel invocation #
# --------------------------------------------------------------------------- #
def fused_decoder_kernel(ids_ref, emb_ref, h0_ref, wih_ref, whh_ref,
                         bgi_ref, bhn_ref, wout_ref, bout_ref,
                         pred_ref, hlast_ref, x_ref,
                         *, seq, batch, hidden_size):
    """Single-invocation Embedding-gather + ReLU + GRU + Linear(output[0]).

    ids_ref : (seq, batch) int32   SMEM  token ids
    emb_ref : (vocab, dec_hidden) f32 VMEM  embedding table (row 0 == padding)
    h0_ref  : (batch, H) f32
    wih_ref : (dec_hidden, 3H) bf16   input->gates weights (pre-transposed)
    whh_ref : (H, 3H) bf16            hidden->gates weights (pre-transposed)
    bgi_ref : (1, 3H) f32             b_ih + [b_hh_r, b_hh_z, 0]  (folded)
    bhn_ref : (1, H) f32              b_hh_n (must stay inside r * (.))
    wout_ref: (H, vocab) bf16         out-Linear weight (pre-transposed)
    bout_ref: (1, vocab) f32
    x_ref   : (seq*batch, dec_hidden) f32 VMEM scratch (gathered embeddings)
    """
    H = hidden_size

    # -- in-kernel embedding gather: seq*batch dynamic row reads --------------
    for t in range(seq):
        for b in range(batch):
            tok = ids_ref[t, b]                       # SMEM scalar read
            x_ref[pl.ds(t * batch + b, 1), :] = emb_ref[pl.ds(tok, 1), :]

    # -- hoisted ReLU + input projection for ALL timesteps (one MXU matmul) ---
    x = jnp.maximum(x_ref[...], 0.0)
    gi_all = (jnp.dot(x.astype(jnp.bfloat16), wih_ref[...],
                      preferred_element_type=jnp.float32) + bgi_ref[...])
    bhn = jnp.broadcast_to(bhn_ref[...], (batch, H))   # broadcast once, not per step

    # -- serial GRU recurrence (short static trip count -> fully unrolled) ----
    # TODO(synk): switch to lax.fori_loop(..., unroll=True) if seq grows >8-16.
    # TODO(synk): weight-stationary w_hh via pltpu.matmul_push_rhs only pays off
    #             at long seq; skipped at seq=4.
    h = h0_ref[...]                                    # (batch, H) f32
    for t in range(seq):
        gi = gi_all[t * batch:(t + 1) * batch]         # static, sublane-aligned
        gh = jnp.dot(h.astype(jnp.bfloat16), whh_ref[...],
                     preferred_element_type=jnp.float32)
        r = jax.nn.sigmoid(gi[:, 0:H] + gh[:, 0:H])
        z = jax.nn.sigmoid(gi[:, H:2 * H] + gh[:, H:2 * H])
        n = jnp.tanh(gi[:, 2 * H:] + r * (gh[:, 2 * H:] + bhn))
        h = (1.0 - z) * n + z * h                      # f32 gate math (v5e-safe)
        if t == 0:
            # prediction = self.out(output[0]) fused right here: no second
            # launch, no h_first HBM roundtrip.  Raw logits (spec has no
            # log_softmax).
            pred_ref[...] = (jnp.dot(h.astype(jnp.bfloat16), wout_ref[...],
                                     preferred_element_type=jnp.float32)
                             + bout_ref[...])
    hlast_ref[...] = h


# --------------------------------------------------------------------------- #
# Large-vocab fallback: recurrence kernel + vocab-tiled output projection     #
# --------------------------------------------------------------------------- #
def gru_recurrence_kernel(emb_ref, h0_ref, wih_ref, whh_ref, bgi_ref, bhn_ref,
                          hfirst_ref, hlast_ref, *, seq, batch, hidden_size):
    """Recurrence-only kernel (fallback path).  h_first emitted in bf16 since
    it is only consumed by the bf16 MXU of the vocab-tiled out projection."""
    H = hidden_size
    x = jnp.maximum(emb_ref[...], 0.0).reshape(seq * batch, -1)
    gi_all = (jnp.dot(x.astype(jnp.bfloat16), wih_ref[...],
                      preferred_element_type=jnp.float32) + bgi_ref[...])
    bhn = jnp.broadcast_to(bhn_ref[...], (batch, H))
    h = h0_ref[...]
    for t in range(seq):
        gi = gi_all[t * batch:(t + 1) * batch]
        gh = jnp.dot(h.astype(jnp.bfloat16), whh_ref[...],
                     preferred_element_type=jnp.float32)
        r = jax.nn.sigmoid(gi[:, 0:H] + gh[:, 0:H])
        z = jax.nn.sigmoid(gi[:, H:2 * H] + gh[:, H:2 * H])
        n = jnp.tanh(gi[:, 2 * H:] + r * (gh[:, 2 * H:] + bhn))
        h = (1.0 - z) * n + z * h
        if t == 0:
            hfirst_ref[...] = h.astype(jnp.bfloat16)
    hlast_ref[...] = h


def out_proj_kernel(h_ref, w_ref, b_ref, o_ref):
    # prediction = self.out(output[0]); tiled over the vocab (N) dim.
    # h_ref is already bf16 -> no per-tile cast on the vocab loop.
    o_ref[...] = (jnp.dot(h_ref[...], w_ref[...],
                          preferred_element_type=jnp.float32) + b_ref[...])


# --------------------------------------------------------------------------- #
# Wrapper                                                                     #
# --------------------------------------------------------------------------- #
def decoder_rnn_forward(input_ids, hidden, params,
                        fuse_vmem_budget=12 * 1024 * 1024):
    """input_ids: (seq, batch) int32, hidden: (1, batch, enc_hidden) f32.

    If all weights + activations fit under `fuse_vmem_budget`, use the single
    fully-fused kernel; otherwise fall back to the two-call split (XLA
    embedding gather + recurrence kernel + vocab-tiled out projection) which
    keeps huge vocabularies out of VMEM (v7x: 64 MiB) and lets the 'parallel'
    vocab grid be split across v7x's two TensorCores.
    """
    seq, batch = input_ids.shape
    vocab, dec_hidden = params["embedding"].shape
    enc_hidden = hidden.shape[-1]
    output_size = params["w_out"].shape[1]
    H = enc_hidden
    h0 = hidden[0]                                      # (batch, H)

    # Fold b_ih plus the r/z slice of b_hh into one pre-added bias; the n-gate
    # bias b_hh_n must stay inside r * (.) so it is passed separately.
    b_gi = params["b_ih"] + jnp.concatenate(
        [params["b_hh"][:, :2 * H],
         jnp.zeros((1, H), params["b_hh"].dtype)], axis=-1)
    b_hn = params["b_hh"][:, 2 * H:]

    def nbytes(a):
        return a.size * a.dtype.itemsize

    fused_bytes = (nbytes(params["embedding"]) + nbytes(params["w_ih_t"])
                   + nbytes(params["w_hh_t"]) + nbytes(params["w_out"])
                   + nbytes(params["b_out"]) + nbytes(b_gi)
                   + seq * batch * (dec_hidden + 3 * H) * 4   # scratch + gi_all
                   + batch * (output_size + H) * 4)           # outputs

    if fused_bytes <= fuse_vmem_budget:
        # ---------------- fully fused single-launch path ---------------------
        kernel = functools.partial(fused_decoder_kernel, seq=seq, batch=batch,
                                   hidden_size=H)
        vmem = pl.BlockSpec(memory_space=pltpu.MemorySpace.VMEM)
        smem = pl.BlockSpec(memory_space=pltpu.MemorySpace.SMEM)
        pred, h_last = pl.pallas_call(
            kernel,
            out_shape=(
                jax.ShapeDtypeStruct((batch, output_size), jnp.float32),
                jax.ShapeDtypeStruct((batch, H), jnp.float32),
            ),
            in_specs=[smem] + [vmem] * 8,
            out_specs=(vmem, vmem),
            scratch_shapes=[pltpu.VMEM((seq * batch, dec_hidden), jnp.float32)],
        )(input_ids, params["embedding"], h0, params["w_ih_t"],
          params["w_hh_t"], b_gi, b_hn, params["w_out"], params["b_out"])
        return pred, h_last[None]                       # hidden back to (1,B,H)

    # -------------------- large-vocab two-call fallback -----------------------
    # TODO(synk): large-table embedding gather stays in XLA glue (an in-kernel
    # version would need a manual multi-row DMA gather with in-flight copies).
    emb = params["embedding"][input_ids]                # (seq, batch, dec_hidden)

    kernel = functools.partial(gru_recurrence_kernel, seq=seq, batch=batch,
                               hidden_size=H)
    vmem = pl.BlockSpec(memory_space=pltpu.MemorySpace.VMEM)
    h_first, h_last = pl.pallas_call(
        kernel,
        out_shape=(
            jax.ShapeDtypeStruct((batch, H), jnp.bfloat16),
            jax.ShapeDtypeStruct((batch, H), jnp.float32),
        ),
        in_specs=[vmem] * 6,
        out_specs=(vmem, vmem),
    )(emb, h0, params["w_ih_t"], params["w_hh_t"], b_gi, b_hn)

    # Vocab-tiled output Linear: tv=4096 (bf16 tile ~1 MiB, x2 double-buffers)
    # amortizes per-grid-step overhead; 'parallel' lets v7x split the vocab
    # grid across both TensorCores.
    # TODO(synk): on v7x an fp8 w_out (+ per-tile scale) would halve this stream.
    tv = min(output_size, 4096)
    pred = pl.pallas_call(
        out_proj_kernel,
        out_shape=jax.ShapeDtypeStruct((batch, output_size), jnp.float32),
        grid_spec=pltpu.PrefetchScalarGridSpec(
            num_scalar_prefetch=0,
            grid=(pl.cdiv(output_size, tv),),
            in_specs=[
                pl.BlockSpec((batch, H), lambda j: (0, 0)),
                pl.BlockSpec((H, tv), lambda j: (0, j)),
                pl.BlockSpec((1, tv), lambda j: (0, j)),
            ],
            out_specs=pl.BlockSpec((batch, tv), lambda j: (0, j)),
        ),
        compiler_params=pltpu.CompilerParams(
            dimension_semantics=("parallel",)),
    )(h_first, params["w_out"], params["b_out"])

    return pred, h_last[None]


# --------------------------------------------------------------------------- #
# Pure-JAX reference (PyTorch GRU semantics; matmul inputs bf16-rounded to    #
# mirror the kernel's bf16-weight / f32-accumulate MXU path)                  #
# --------------------------------------------------------------------------- #
def reference_forward(input_ids, hidden, params):
    def bf(a):
        return a.astype(jnp.bfloat16).astype(jnp.float32)

    x = jnp.maximum(params["embedding"][input_ids], 0.0)
    h = hidden[0]
    H = h.shape[-1]
    w_ih = params["w_ih_t"].astype(jnp.float32)
    w_hh = params["w_hh_t"].astype(jnp.float32)
    w_out = params["w_out"].astype(jnp.float32)

    def step(h, x_t):
        gi = bf(x_t) @ w_ih + params["b_ih"][0]
        gh = bf(h) @ w_hh + params["b_hh"][0]
        r = jax.nn.sigmoid(gi[:, :H] + gh[:, :H])
        z = jax.nn.sigmoid(gi[:, H:2 * H] + gh[:, H:2 * H])
        n = jnp.tanh(gi[:, 2 * H:] + r * gh[:, 2 * H:])
        h_new = (1.0 - z) * n + z * h
        return h_new, h_new

    h_last, outs = jax.lax.scan(step, h, x)
    pred = bf(outs[0]) @ w_out + params["b_out"][0]
    return pred, h_last[None]


def init_params(key, enc_hidden, dec_hidden, output_size):
    ks = jax.random.split(key, 7)
    k = 1.0 / jnp.sqrt(enc_hidden)
    emb = jax.random.normal(ks[0], (output_size, dec_hidden), jnp.float32)
    emb = emb.at[0].set(0.0)                            # padding_idx=0 row is zero

    def u(kk, shape):
        return jax.random.uniform(kk, shape, jnp.float32, -k, k)

    return {
        "embedding": emb,
        # PyTorch weight_ih_l0 is (3H, dec_hidden); stored transposed + bf16.
        "w_ih_t": u(ks[1], (dec_hidden, 3 * enc_hidden)).astype(jnp.bfloat16),
        "w_hh_t": u(ks[2], (enc_hidden, 3 * enc_hidden)).astype(jnp.bfloat16),
        "b_ih": u(ks[3], (1, 3 * enc_hidden)),
        "b_hh": u(ks[4], (1, 3 * enc_hidden)),
        # nn.Linear(enc_hidden, output_size) weight is (out, in); stored transposed.
        "w_out": u(ks[5], (enc_hidden, output_size)).astype(jnp.bfloat16),
        "b_out": u(ks[6], (1, output_size)),
    }


if __name__ == "__main__":
    ENC_HIDDEN = 128     # enc_hidden_size (GRU hidden)
    DEC_HIDDEN = 128     # dec_hidden_size (embedding dim / GRU input)
    OUTPUT_SIZE = 256    # vocab size
    SEQ, BATCH = 4, 8

    root = jax.random.PRNGKey(0)
    k_param, k_ids, k_h = jax.random.split(root, 3)

    params = init_params(k_param, ENC_HIDDEN, DEC_HIDDEN, OUTPUT_SIZE)
    input_ids = jax.random.randint(k_ids, (SEQ, BATCH), 0, OUTPUT_SIZE, jnp.int32)
    hidden0 = jax.random.normal(k_h, (1, BATCH, ENC_HIDDEN), jnp.float32)

    pred_ref, hidden_ref = reference_forward(input_ids, hidden0, params)

    # Fully fused single-kernel path (weights fit VMEM at these sizes).
    fused_fn = jax.jit(decoder_rnn_forward)
    pred, hidden = fused_fn(input_ids, hidden0, params)
    jax.block_until_ready((pred, hidden))
    assert pred.shape == (BATCH, OUTPUT_SIZE)
    assert hidden.shape == (1, BATCH, ENC_HIDDEN)
    assert jnp.allclose(pred, pred_ref, rtol=2e-4, atol=2e-4)
    assert jnp.allclose(hidden, hidden_ref, rtol=2e-4, atol=2e-4)

    # Two-call large-vocab fallback path (forced), validated against the same
    # reference.
    split_fn = jax.jit(functools.partial(decoder_rnn_forward, fuse_vmem_budget=0))
    pred2, hidden2 = split_fn(input_ids, hidden0, params)
    jax.block_until_ready((pred2, hidden2))
    assert jnp.allclose(pred2, pred_ref, rtol=2e-4, atol=2e-4)
    assert jnp.allclose(hidden2, hidden_ref, rtol=2e-4, atol=2e-4)

    print("KERNEL_OK")
</pallas_src>

<mosaic_0001>
module attributes {stable_mosaic.version = 11 : i64} {
  func.func @fused_decoder_kernel(%arg0: memref<4x8xi32, #tpu.memory_space<smem>>, %arg1: memref<256x128xf32, #tpu.memory_space<vmem>>, %arg2: memref<8x128xf32, #tpu.memory_space<vmem>>, %arg3: memref<128x384xbf16, #tpu.memory_space<vmem>>, %arg4: memref<128x384xbf16, #tpu.memory_space<vmem>>, %arg5: memref<1x384xf32, #tpu.memory_space<vmem>>, %arg6: memref<1x128xf32, #tpu.memory_space<vmem>>, %arg7: memref<128x256xbf16, #tpu.memory_space<vmem>>, %arg8: memref<1x256xf32, #tpu.memory_space<vmem>>, %arg9: memref<8x256xf32, #tpu.memory_space<vmem>>, %arg10: memref<8x128xf32, #tpu.memory_space<vmem>>, %arg11: memref<32x128xf32, #tpu.memory_space<vmem>>) attributes {dimension_semantics = [], scalar_prefetch = 0 : i64, scratch_operands = 1 : i64, tpu.core_type = #tpu.core_type<tc>} {
    %c0 = arith.constant 0 : index
    %c0_0 = arith.constant 0 : index
    %0 = memref.load %arg0[%c0, %c0_0] : memref<4x8xi32, #tpu.memory_space<smem>>
    %1 = arith.index_cast %0 : i32 to index
    %c0_1 = arith.constant 0 : index
    %2 = vector.load %arg1[%1, %c0_1] : memref<256x128xf32, #tpu.memory_space<vmem>>, vector<1x128xf32>
    %c0_2 = arith.constant 0 : index
    %c0_3 = arith.constant 0 : index
    %3 = vector.load %arg11[%c0_2, %c0_3] : memref<32x128xf32, #tpu.memory_space<vmem>>, vector<1x128xf32>
    tpu.vector_store %arg11[%c0_2, %c0_3], %2 {strides = array<i32>} : memref<32x128xf32, #tpu.memory_space<vmem>>, vector<1x128xf32>,
    %c0_4 = arith.constant 0 : index
    %c1 = arith.constant 1 : index
    %4 = memref.load %arg0[%c0_4, %c1] : memref<4x8xi32, #tpu.memory_space<smem>>
    %5 = arith.index_cast %4 : i32 to index
    %c0_5 = arith.constant 0 : index
    %6 = vector.load %arg1[%5, %c0_5] : memref<256x128xf32, #tpu.memory_space<vmem>>, vector<1x128xf32>
    %c1_6 = arith.constant 1 : index
    %c0_7 = arith.constant 0 : index
    %7 = vector.load %arg11[%c1_6, %c0_7] : memref<32x128xf32, #tpu.memory_space<vmem>>, vector<1x128xf32>
    tpu.vector_store %arg11[%c1_6, %c0_7], %6 {strides = array<i32>} : memref<32x128xf32, #tpu.memory_space<vmem>>, vector<1x128xf32>,
    %c0_8 = arith.constant 0 : index
    %c2 = arith.constant 2 : index
    %8 = memref.load %arg0[%c0_8, %c2] : memref<4x8xi32, #tpu.memory_space<smem>>
    %9 = arith.index_cast %8 : i32 to index
    %c0_9 = arith.constant 0 : index
    %10 = vector.load %arg1[%9, %c0_9] : memref<256x128xf32, #tpu.memory_space<vmem>>, vector<1x128xf32>
    %c2_10 = arith.constant 2 : index
    %c0_11 = arith.constant 0 : index
    %11 = vector.load %arg11[%c2_10, %c0_11] : memref<32x128xf32, #tpu.memory_space<vmem>>, vector<1x128xf32>
    tpu.vector_store %arg11[%c2_10, %c0_11], %10 {strides = array<i32>} : memref<32x128xf32, #tpu.memory_space<vmem>>, vector<1x128xf32>,
    %c0_12 = arith.constant 0 : index
    %c3 = arith.constant 3 : index
    %12 = memref.load %arg0[%c0_12, %c3] : memref<4x8xi32, #tpu.memory_space<smem>>
    %13 = arith.index_cast %12 : i32 to index
    %c0_13 = arith.constant 0 : index
    %14 = vector.load %arg1[%13, %c0_13] : memref<256x128xf32, #tpu.memory_space<vmem>>, vector<1x128xf32>
    %c3_14 = arith.constant 3 : index
    %c0_15 = arith.constant 0 : index
    %15 = vector.load %arg11[%c3_14, %c0_15] : memref<32x128xf32, #tpu.memory_space<vmem>>, vector<1x128xf32>
    tpu.vector_store %arg11[%c3_14, %c0_15], %14 {strides = array<i32>} : memref<32x128xf32, #tpu.memory_space<vmem>>, vector<1x128xf32>,
    %c0_16 = arith.constant 0 : index
    %c4 = arith.constant 4 : index
    %16 = memref.load %arg0[%c0_16, %c4] : memref<4x8xi32, #tpu.memory_space<smem>>
    %17 = arith.index_cast %16 : i32 to index
    %c0_17 = arith.constant 0 : index
    %18 = vector.load %arg1[%17, %c0_17] : memref<256x128xf32, #tpu.memory_space<vmem>>, vector<1x128xf32>
    %c4_18 = arith.constant 4 : index
    %c0_19 = arith.constant 0 : index
    %19 = vector.load %arg11[%c4_18, %c0_19] : memref<32x128xf32, #tpu.memory_space<vmem>>, vector<1x128xf32>
    tpu.vector_store %arg11[%c4_18, %c0_19], %18 {strides = array<i32>} : memref<32x128xf32, #tpu.memory_space<vmem>>, vector<1x128xf32>,
    %c0_20 = arith.constant 0 : index
    %c5 = arith.constant 5 : index
    %20 = memref.load %arg0[%c0_20, %c5] : memref<4x8xi32, #tpu.memory_space<smem>>
    %21 = arith.index_cast %20 : i32 to index
    %c0_21 = arith.constant 0 : index
    %22 = vector.load %arg1[%21, %c0_21] : memref<256x128xf32, #tpu.memory_space<vmem>>, vector<1x128xf32>
    %c5_22 = arith.constant 5 : index
    %c0_23 = arith.constant 0 : index
    %23 = vector.load %arg11[%c5_22, %c0_23] : memref<32x128xf32, #tpu.memory_space<vmem>>, vector<1x128xf32>
    tpu.vector_store %arg11[%c5_22, %c0_23], %22 {strides = array<i32>} : memref<32x128xf32, #tpu.memory_space<vmem>>, vector<1x128xf32>,
    %c0_24 = arith.constant 0 : index
    %c6 = arith.constant 6 : index
    %24 = memref.load %arg0[%c0_24, %c6] : memref<4x8xi32, #tpu.memory_space<smem>>
    %25 = arith.index_cast %24 : i32 to index
    %c0_25 = arith.constant 0 : index
    %26 = vector.load %arg1[%25, %c0_25] : memref<256x128xf32, #tpu.memory_space<vmem>>, vector<1x128xf32>
    %c6_26 = arith.constant 6 : index
    %c0_27 = arith.constant 0 : index
    %27 = vector.load %arg11[%c6_26, %c0_27] : memref<32x128xf32, #tpu.memory_space<vmem>>, vector<1x128xf32>
    tpu.vector_store %arg11[%c6_26, %c0_27], %26 {strides = array<i32>} : memref<32x128xf32, #tpu.memory_space<vmem>>, vector<1x128xf32>,
    %c0_28 = arith.constant 0 : index
    %c7 = arith.constant 7 : index
    %28 = memref.load %arg0[%c0_28, %c7] : memref<4x8xi32, #tpu.memory_space<smem>>
    %29 = arith.index_cast %28 : i32 to index
    %c0_29 = arith.constant 0 : index
    %30 = vector.load %arg1[%29, %c0_29] : memref<256x128xf32, #tpu.memory_space<vmem>>, vector<1x128xf32>
    %c7_30 = arith.constant 7 : index
    %c0_31 = arith.constant 0 : index
    %31 = vector.load %arg11[%c7_30, %c0_31] : memref<32x128xf32, #tpu.memory_space<vmem>>, vector<1x128xf32>
    tpu.vector_store %arg11[%c7_30, %c0_31], %30 {strides = array<i32>} : memref<32x128xf32, #tpu.memory_space<vmem>>, vector<1x128xf32>,
    %c1_32 = arith.constant 1 : index
    %c0_33 = arith.constant 0 : index
    %32 = memref.load %arg0[%c1_32, %c0_33] : memref<4x8xi32, #tpu.memory_space<smem>>
    %33 = arith.index_cast %32 : i32 to index
    %c0_34 = arith.constant 0 : index
    %34 = vector.load %arg1[%33, %c0_34] : memref<256x128xf32, #tpu.memory_space<vmem>>, vector<1x128xf32>
    %c8 = arith.constant 8 : index
    %c0_35 = arith.constant 0 : index
    %35 = vector.load %arg11[%c8, %c0_35] : memref<32x128xf32, #tpu.memory_space<vmem>>, vector<1x128xf32>
    tpu.vector_store %arg11[%c8, %c0_35], %34 {strides = array<i32>} : memref<32x128xf32, #tpu.memory_space<vmem>>, vector<1x128xf32>,
    %c1_36 = arith.constant 1 : index
    %c1_37 = arith.constant 1 : index
    %36 = memref.load %arg0[%c1_36, %c1_37] : memref<4x8xi32, #tpu.memory_space<smem>>
    %37 = arith.index_cast %36 : i32 to index
    %c0_38 = arith.constant 0 : index
    %38 = vector.load %arg1[%37, %c0_38] : memref<256x128xf32, #tpu.memory_space<vmem>>, vector<1x128xf32>
    %c9 = arith.constant 9 : index
    %c0_39 = arith.constant 0 : index
    %39 = vector.load %arg11[%c9, %c0_39] : memref<32x128xf32, #tpu.memory_space<vmem>>, vector<1x128xf32>
    tpu.vector_store %arg11[%c9, %c0_39], %38 {strides = array<i32>} : memref<32x128xf32, #tpu.memory_space<vmem>>, vector<1x128xf32>,
    %c1_40 = arith.constant 1 : index
    %c2_41 = arith.constant 2 : index
    %40 = memref.load %arg0[%c1_40, %c2_41] : memref<4x8xi32, #tpu.memory_space<smem>>
    %41 = arith.index_cast %40 : i32 to index
    %c0_42 = arith.constant 0 : index
    %42 = vector.load %arg1[%41, %c0_42] : memref<256x128xf32, #tpu.memory_space<vmem>>, vector<1x128xf32>
    %c10 = arith.constant 10 : index
    %c0_43 = arith.constant 0 : index
    %43 = vector.load %arg11[%c10, %c0_43] : memref<32x128xf32, #tpu.memory_space<vmem>>, vector<1x128xf32>
    tpu.vector_store %arg11[%c10, %c0_43], %42 {strides = array<i32>} : memref<32x128xf32, #tpu.memory_space<vmem>>, vector<1x128xf32>,
    %c1_44 = arith.constant 1 : index
    %c3_45 = arith.constant 3 : index
    %44 = memref.load %arg0[%c1_44, %c3_45] : memref<4x8xi32, #tpu.memory_space<smem>>
    %45 = arith.index_cast %44 : i32 to index
    %c0_46 = arith.constant 0 : index
    %46 = vector.load %arg1[%45, %c0_46] : memref<256x128xf32, #tpu.memory_space<vmem>>, vector<1x128xf32>
    %c11 = arith.constant 11 : index
    %c0_47 = arith.constant 0 : index
    %47 = vector.load %arg11[%c11, %c0_47] : memref<32x128xf32, #tpu.memory_space<vmem>>, vector<1x128xf32>
    tpu.vector_store %arg11[%c11, %c0_47], %46 {strides = array<i32>} : memref<32x128xf32, #tpu.memory_space<vmem>>, vector<1x128xf32>,
    %c1_48 = arith.constant 1 : index
    %c4_49 = arith.constant 4 : index
    %48 = memref.load %arg0[%c1_48, %c4_49] : memref<4x8xi32, #tpu.memory_space<smem>>
    %49 = arith.index_cast %48 : i32 to index
    %c0_50 = arith.constant 0 : index
    %50 = vector.load %arg1[%49, %c0_50] : memref<256x128xf32, #tpu.memory_space<vmem>>, vector<1x128xf32>
    %c12 = arith.constant 12 : index
    %c0_51 = arith.constant 0 : index
    %51 = vector.load %arg11[%c12, %c0_51] : memref<32x128xf32, #tpu.memory_space<vmem>>, vector<1x128xf32>
    tpu.vector_store %arg11[%c12, %c0_51], %50 {strides = array<i32>} : memref<32x128xf32, #tpu.memory_space<vmem>>, vector<1x128xf32>,
    %c1_52 = arith.constant 1 : index
    %c5_53 = arith.constant 5 : index
    %52 = memref.load %arg0[%c1_52, %c5_53] : memref<4x8xi32, #tpu.memory_space<smem>>
    %53 = arith.index_cast %52 : i32 to index
    %c0_54 = arith.constant 0 : index
    %54 = vector.load %arg1[%53, %c0_54] : memref<256x128xf32, #tpu.memory_space<vmem>>, vector<1x128xf32>
    %c13 = arith.constant 13 : index
    %c0_55 = arith.constant 0 : index
    %55 = vector.load %arg11[%c13, %c0_55] : memref<32x128xf32, #tpu.memory_space<vmem>>, vector<1x128xf32>
    tpu.vector_store %arg11[%c13, %c0_55], %54 {strides = array<i32>} : memref<32x128xf32, #tpu.memory_space<vmem>>, vector<1x128xf32>,
    %c1_56 = arith.constant 1 : index
    %c6_57 = arith.constant 6 : index
    %56 = memref.load %arg0[%c1_56, %c6_57] : memref<4x8xi32, #tpu.memory_space<smem>>
    %57 = arith.index_cast %56 : i32 to index
    %c0_58 = arith.constant 0 : index
    %58 = vector.load %arg1[%57, %c0_58] : memref<256x128xf32, #tpu.memory_space<vmem>>, vector<1x128xf32>
    %c14 = arith.constant 14 : index
    %c0_59 = arith.constant 0 : index
    %59 = vector.load %arg11[%c14, %c0_59] : memref<32x128xf32, #tpu.memory_space<vmem>>, vector<1x128xf32>
    tpu.vector_store %arg11[%c14, %c0_59], %58 {strides = array<i32>} : memref<32x128xf32, #tpu.memory_space<vmem>>, vector<1x128xf32>,
    %c1_60 = arith.constant 1 : index
    %c7_61 = arith.constant 7 : index
    %60 = memref.load %arg0[%c1_60, %c7_61] : memref<4x8xi32, #tpu.memory_space<smem>>
    %61 = arith.index_cast %60 : i32 to index
    %c0_62 = arith.constant 0 : index
    %62 = vector.load %arg1[%61, %c0_62] : memref<256x128xf32, #tpu.memory_space<vmem>>, vector<1x128xf32>
    %c15 = arith.constant 15 : index
    %c0_63 = arith.constant 0 : index
    %63 = vector.load %arg11[%c15, %c0_63] : memref<32x128xf32, #tpu.memory_space<vmem>>, vector<1x128xf32>
    tpu.vector_store %arg11[%c15, %c0_63], %62 {strides = array<i32>} : memref<32x128xf32, #tpu.memory_space<vmem>>, vector<1x128xf32>,
    %c2_64 = arith.constant 2 : index
    %c0_65 = arith.constant 0 : index
    %64 = memref.load %arg0[%c2_64, %c0_65] : memref<4x8xi32, #tpu.memory_space<smem>>
    %65 = arith.index_cast %64 : i32 to index
    %c0_66 = arith.constant 0 : index
    %66 = vector.load %arg1[%65, %c0_66] : memref<256x128xf32, #tpu.memory_space<vmem>>, vector<1x128xf32>
    %c16 = arith.constant 16 : index
    %c0_67 = arith.constant 0 : index
    %67 = vector.load %arg11[%c16, %c0_67] : memref<32x128xf32, #tpu.memory_space<vmem>>, vector<1x128xf32>
    tpu.vector_store %arg11[%c16, %c0_67], %66 {strides = array<i32>} : memref<32x128xf32, #tpu.memory_space<vmem>>, vector<1x128xf32>,
    %c2_68 = arith.constant 2 : index
    %c1_69 = arith.constant 1 : index
    %68 = memref.load %arg0[%c2_68, %c1_69] : memref<4x8xi32, #tpu.memory_space<smem>>
    %69 = arith.index_cast %68 : i32 to index
    %c0_70 = arith.constant 0 : index
    %70 = vector.load %arg1[%69, %c0_70] : memref<256x128xf32, #tpu.memory_space<vmem>>, vector<1x128xf32>
    %c17 = arith.constant 17 : index
    %c0_71 = arith.constant 0 : index
    %71 = vector.load %arg11[%c17, %c0_71] : memref<32x128xf32, #tpu.memory_space<vmem>>, vector<1x128xf32>
    tpu.vector_store %arg11[%c17, %c0_71], %70 {strides = array<i32>} : memref<32x128xf32, #tpu.memory_space<vmem>>, vector<1x128xf32>,
    %c2_72 = arith.constant 2 : index
    %c2_73 = arith.constant 2 : index
    %72 = memref.load %arg0[%c2_72, %c2_73] : memref<4x8xi32, #tpu.memory_space<smem>>
    %73 = arith.index_cast %72 : i32 to index
    %c0_74 = arith.constant 0 : index
    %74 = vector.load %arg1[%73, %c0_74] : memref<256x128xf32, #tpu.memory_space<vmem>>, vector<1x128xf32>
    %c18 = arith.constant 18 : index
    %c0_75 = arith.constant 0 : index
    %75 = vector.load %arg11[%c18, %c0_75] : memref<32x128xf32, #tpu.memory_space<vmem>>, vector<1x128xf32>
    tpu.vector_store %arg11[%c18, %c0_75], %74 {strides = array<i32>} : memref<32x128xf32, #tpu.memory_space<vmem>>, vector<1x128xf32>,
    %c2_76 = arith.constant 2 : index
    %c3_77 = arith.constant 3 : index
    %76 = memref.load %arg0[%c2_76, %c3_77] : memref<4x8xi32, #tpu.memory_space<smem>>
    %77 = arith.index_cast %76 : i32 to index
    %c0_78 = arith.constant 0 : index
    %78 = vector.load %arg1[%77, %c0_78] : memref<256x128xf32, #tpu.memory_space<vmem>>, vector<1x128xf32>
    %c19 = arith.constant 19 : index
    %c0_79 = arith.constant 0 : index
    %79 = vector.load %arg11[%c19, %c0_79] : memref<32x128xf32, #tpu.memory_space<vmem>>, vector<1x128xf32>
    tpu.vector_store %arg11[%c19, %c0_79], %78 {strides = array<i32>} : memref<32x128xf32, #tpu.memory_space<vmem>>, vector<1x128xf32>,
    %c2_80 = arith.constant 2 : index
    %c4_81 = arith.constant 4 : index
    %80 = memref.load %arg0[%c2_80, %c4_81] : memref<4x8xi32, #tpu.memory_space<smem>>
    %81 = arith.index_cast %80 : i32 to index
    %c0_82 = arith.constant 0 : index
    %82 = vector.load %arg1[%81, %c0_82] : memref<256x128xf32, #tpu.memory_space<vmem>>, vector<1x128xf32>
    %c20 = arith.constant 20 : index
    %c0_83 = arith.constant 0 : index
    %83 = vector.load %arg11[%c20, %c0_83] : memref<32x128xf32, #tpu.memory_space<vmem>>, vector<1x128xf32>
    tpu.vector_store %arg11[%c20, %c0_83], %82 {strides = array<i32>} : memref<32x128xf32, #tpu.memory_space<vmem>>, vector<1x128xf32>,
    %c2_84 = arith.constant 2 : index
    %c5_85 = arith.constant 5 : index
    %84 = memref.load %arg0[%c2_84, %c5_85] : memref<4x8xi32, #tpu.memory_space<smem>>
    %85 = arith.index_cast %84 : i32 to index
    %c0_86 = arith.constant 0 : index
    %86 = vector.load %arg1[%85, %c0_86] : memref<256x128xf32, #tpu.memory_space<vmem>>, vector<1x128xf32>
    %c21 = arith.constant 21 : index
    %c0_87 = arith.constant 0 : index
    %87 = vector.load %arg11[%c21, %c0_87] : memref<32x128xf32, #tpu.memory_space<vmem>>, vector<1x128xf32>
    tpu.vector_store %arg11[%c21, %c0_87], %86 {strides = array<i32>} : memref<32x128xf32, #tpu.memory_space<vmem>>, vector<1x128xf32>,
    %c2_88 = arith.constant 2 : index
    %c6_89 = arith.constant 6 : index
    %88 = memref.load %arg0[%c2_88, %c6_89] : memref<4x8xi32, #tpu.memory_space<smem>>
    %89 = arith.index_cast %88 : i32 to index
    %c0_90 = arith.constant 0 : index
    %90 = vector.load %arg1[%89, %c0_90] : memref<256x128xf32, #tpu.memory_space<vmem>>, vector<1x128xf32>
    %c22 = arith.constant 22 : index
    %c0_91 = arith.constant 0 : index
    %91 = vector.load %arg11[%c22, %c0_91] : memref<32x128xf32, #tpu.memory_space<vmem>>, vector<1x128xf32>
    tpu.vector_store %arg11[%c22, %c0_91], %90 {strides = array<i32>} : memref<32x128xf32, #tpu.memory_space<vmem>>, vector<1x128xf32>,
    %c2_92 = arith.constant 2 : index
    %c7_93 = arith.constant 7 : index
    %92 = memref.load %arg0[%c2_92, %c7_93] : memref<4x8xi32, #tpu.memory_space<smem>>
    %93 = arith.index_cast %92 : i32 to index
    %c0_94 = arith.constant 0 : index
    %94 = vector.load %arg1[%93, %c0_94] : memref<256x128xf32, #tpu.memory_space<vmem>>, vector<1x128xf32>
    %c23 = arith.constant 23 : index
    %c0_95 = arith.constant 0 : index
    %95 = vector.load %arg11[%c23, %c0_95] : memref<32x128xf32, #tpu.memory_space<vmem>>, vector<1x128xf32>
    tpu.vector_store %arg11[%c23, %c0_95], %94 {strides = array<i32>} : memref<32x128xf32, #tpu.memory_space<vmem>>, vector<1x128xf32>,
    %c3_96 = arith.constant 3 : index
    %c0_97 = arith.constant 0 : index
    %96 = memref.load %arg0[%c3_96, %c0_97] : memref<4x8xi32, #tpu.memory_space<smem>>
    %97 = arith.index_cast %96 : i32 to index
    %c0_98 = arith.constant 0 : index
    %98 = vector.load %arg1[%97, %c0_98] : memref<256x128xf32, #tpu.memory_space<vmem>>, vector<1x128xf32>
    %c24 = arith.constant 24 : index
    %c0_99 = arith.constant 0 : index
    %99 = vector.load %arg11[%c24, %c0_99] : memref<32x128xf32, #tpu.memory_space<vmem>>, vector<1x128xf32>
    tpu.vector_store %arg11[%c24, %c0_99], %98 {strides = array<i32>} : memref<32x128xf32, #tpu.memory_space<vmem>>, vector<1x128xf32>,
    %c3_100 = arith.constant 3 : index
    %c1_101 = arith.constant 1 : index
    %100 = memref.load %arg0[%c3_100, %c1_101] : memref<4x8xi32, #tpu.memory_space<smem>>
    %101 = arith.index_cast %100 : i32 to index
    %c0_102 = arith.constant 0 : index
    %102 = vector.load %arg1[%101, %c0_102] : memref<256x128xf32, #tpu.memory_space<vmem>>, vector<1x128xf32>
    %c25 = arith.constant 25 : index
    %c0_103 = arith.constant 0 : index
    %103 = vector.load %arg11[%c25, %c0_103] : memref<32x128xf32, #tpu.memory_space<vmem>>, vector<1x128xf32>
    tpu.vector_store %arg11[%c25, %c0_103], %102 {strides = array<i32>} : memref<32x128xf32, #tpu.memory_space<vmem>>, vector<1x128xf32>,
    %c3_104 = arith.constant 3 : index
    %c2_105 = arith.constant 2 : index
    %104 = memref.load %arg0[%c3_104, %c2_105] : memref<4x8xi32, #tpu.memory_space<smem>>
    %105 = arith.index_cast %104 : i32 to index
    %c0_106 = arith.constant 0 : index
    %106 = vector.load %arg1[%105, %c0_106] : memref<256x128xf32, #tpu.memory_space<vmem>>, vector<1x128xf32>
    %c26 = arith.constant 26 : index
    %c0_107 = arith.constant 0 : index
    %107 = vector.load %arg11[%c26, %c0_107] : memref<32x128xf32, #tpu.memory_space<vmem>>, vector<1x128xf32>
    tpu.vector_store %arg11[%c26, %c0_107], %106 {strides = array<i32>} : memref<32x128xf32, #tpu.memory_space<vmem>>, vector<1x128xf32>,
    %c3_108 = arith.constant 3 : index
    %c3_109 = arith.constant 3 : index
    %108 = memref.load %arg0[%c3_108, %c3_109] : memref<4x8xi32, #tpu.memory_space<smem>>
    %109 = arith.index_cast %108 : i32 to index
    %c0_110 = arith.constant 0 : index
    %110 = vector.load %arg1[%109, %c0_110] : memref<256x128xf32, #tpu.memory_space<vmem>>, vector<1x128xf32>
    %c27 = arith.constant 27 : index
    %c0_111 = arith.constant 0 : index
    %111 = vector.load %arg11[%c27, %c0_111] : memref<32x128xf32, #tpu.memory_space<vmem>>, vector<1x128xf32>
    tpu.vector_store %arg11[%c27, %c0_111], %110 {strides = array<i32>} : memref<32x128xf32, #tpu.memory_space<vmem>>, vector<1x128xf32>,
    %c3_112 = arith.constant 3 : index
    %c4_113 = arith.constant 4 : index
    %112 = memref.load %arg0[%c3_112, %c4_113] : memref<4x8xi32, #tpu.memory_space<smem>>
    %113 = arith.index_cast %112 : i32 to index
    %c0_114 = arith.constant 0 : index
    %114 = vector.load %arg1[%113, %c0_114] : memref<256x128xf32, #tpu.memory_space<vmem>>, vector<1x128xf32>
    %c28 = arith.constant 28 : index
    %c0_115 = arith.constant 0 : index
    %115 = vector.load %arg11[%c28, %c0_115] : memref<32x128xf32, #tpu.memory_space<vmem>>, vector<1x128xf32>
    tpu.vector_store %arg11[%c28, %c0_115], %114 {strides = array<i32>} : memref<32x128xf32, #tpu.memory_space<vmem>>, vector<1x128xf32>,
    %c3_116 = arith.constant 3 : index
    %c5_117 = arith.constant 5 : index
    %116 = memref.load %arg0[%c3_116, %c5_117] : memref<4x8xi32, #tpu.memory_space<smem>>
    %117 = arith.index_cast %116 : i32 to index
    %c0_118 = arith.constant 0 : index
    %118 = vector.load %arg1[%117, %c0_118] : memref<256x128xf32, #tpu.memory_space<vmem>>, vector<1x128xf32>
    %c29 = arith.constant 29 : index
    %c0_119 = arith.constant 0 : index
    %119 = vector.load %arg11[%c29, %c0_119] : memref<32x128xf32, #tpu.memory_space<vmem>>, vector<1x128xf32>
    tpu.vector_store %arg11[%c29, %c0_119], %118 {strides = array<i32>} : memref<32x128xf32, #tpu.memory_space<vmem>>, vector<1x128xf32>,
    %c3_120 = arith.constant 3 : index
    %c6_121 = arith.constant 6 : index
    %120 = memref.load %arg0[%c3_120, %c6_121] : memref<4x8xi32, #tpu.memory_space<smem>>
    %121 = arith.index_cast %120 : i32 to index
    %c0_122 = arith.constant 0 : index
    %122 = vector.load %arg1[%121, %c0_122] : memref<256x128xf32, #tpu.memory_space<vmem>>, vector<1x128xf32>
    %c30 = arith.constant 30 : index
    %c0_123 = arith.constant 0 : index
    %123 = vector.load %arg11[%c30, %c0_123] : memref<32x128xf32, #tpu.memory_space<vmem>>, vector<1x128xf32>
    tpu.vector_store %arg11[%c30, %c0_123], %122 {strides = array<i32>} : memref<32x128xf32, #tpu.memory_space<vmem>>, vector<1x128xf32>,
    %c3_124 = arith.constant 3 : index
    %c7_125 = arith.constant 7 : index
    %124 = memref.load %arg0[%c3_124, %c7_125] : memref<4x8xi32, #tpu.memory_space<smem>>
    %125 = arith.index_cast %124 : i32 to index
    %c0_126 = arith.constant 0 : index
    %126 = vector.load %arg1[%125, %c0_126] : memref<256x128xf32, #tpu.memory_space<vmem>>, vector<1x128xf32>
    %c31 = arith.constant 31 : index
    %c0_127 = arith.constant 0 : index
    %127 = vector.load %arg11[%c31, %c0_127] : memref<32x128xf32, #tpu.memory_space<vmem>>, vector<1x128xf32>
    tpu.vector_store %arg11[%c31, %c0_127], %126 {strides = array<i32>} : memref<32x128xf32, #tpu.memory_space<vmem>>, vector<1x128xf32>,
    %c0_128 = arith.constant 0 : index
    %c0_129 = arith.constant 0 : index
    %128 = vector.load %arg11[%c0_128, %c0_129] : memref<32x128xf32, #tpu.memory_space<vmem>>, vector<32x128xf32>
    %cst = arith.constant 0.000000e+00 : f32
    %129 = vector.broadcast %cst : f32 to vector<32x128xf32>
    %130 = arith.maximumf %128, %129 : vector<32x128xf32>
    %131 = arith.truncf %130 : vector<32x128xf32> to vector<32x128xbf16>
    %c0_130 = arith.constant 0 : index
    %c0_131 = arith.constant 0 : index
    %132 = vector.load %arg3[%c0_130, %c0_131] : memref<128x384xbf16, #tpu.memory_space<vmem>>, vector<128x384xbf16>
    %cst_132 = arith.constant dense<0.000000e+00> : vector<32x384xf32>
    %133 = tpu.matmul %131, %132, %cst_132 {dimension_numbers = #tpu.dot_dimension_numbers<[1], [0], [0], [1], [0, 0, 1, 1], [], []>} : vector<32x128xbf16>, vector<128x384xbf16>, vector<32x384xf32> -> vector<32x384xf32>
    %c0_133 = arith.constant 0 : index
    %c0_134 = arith.constant 0 : index
    %134 = vector.load %arg5[%c0_133, %c0_134] : memref<1x384xf32, #tpu.memory_space<vmem>>, vector<1x384xf32>
    %135 = vector.broadcast %134 : vector<1x384xf32> to vector<32x384xf32>
    %136 = arith.addf %133, %135 : vector<32x384xf32>
    %c0_135 = arith.constant 0 : index
    %c0_136 = arith.constant 0 : index
    %137 = vector.load %arg6[%c0_135, %c0_136] : memref<1x128xf32, #tpu.memory_space<vmem>>, vector<1x128xf32>
    %138 = vector.shape_cast %137 : vector<1x128xf32> to vector<1x128xf32>
    %139 = vector.broadcast %138 : vector<1x128xf32> to vector<8x128xf32>
    %c0_137 = arith.constant 0 : index
    %c0_138 = arith.constant 0 : index
    %140 = vector.load %arg2[%c0_137, %c0_138] : memref<8x128xf32, #tpu.memory_space<vmem>>, vector<8x128xf32>
    %141 = vector.extract_strided_slice %136 {offsets = [0, 0], sizes = [8, 384], strides = [1, 1]} : vector<32x384xf32> to vector<8x384xf32>
    %142 = arith.truncf %140 : vector<8x128xf32> to vector<8x128xbf16>
    %c0_139 = arith.constant 0 : index
    %c0_140 = arith.constant 0 : index
    %143 = vector.load %arg4[%c0_139, %c0_140] : memref<128x384xbf16, #tpu.memory_space<vmem>>, vector<128x384xbf16>
    %cst_141 = arith.constant dense<0.000000e+00> : vector<8x384xf32>
    %144 = tpu.matmul %142, %143, %cst_141 {dimension_numbers = #tpu.dot_dimension_numbers<[1], [0], [0], [1], [0, 0, 1, 1], [], []>} : vector<8x128xbf16>, vector<128x384xbf16>, vector<8x384xf32> -> vector<8x384xf32>
    %145 = vector.extract_strided_slice %141 {offsets = [0, 0], sizes = [8, 128], strides = [1, 1]} : vector<8x384xf32> to vector<8x128xf32>
    %146 = vector.extract_strided_slice %144 {offsets = [0, 0], sizes = [8, 128], strides = [1, 1]} : vector<8x384xf32> to vector<8x128xf32>
    %147 = arith.addf %145, %146 : vector<8x128xf32>
    %148 = arith.negf %147 : vector<8x128xf32>
    %149 = math.exp %148 : vector<8x128xf32>
    %cst_142 = arith.constant 1.000000e+00 : f32
    %150 = vector.broadcast %cst_142 : f32 to vector<8x128xf32>
    %151 = arith.addf %150, %149 : vector<8x128xf32>
    %152 = arith.divf %150, %151 : vector<8x128xf32>
    %153 = vector.extract_strided_slice %141 {offsets = [0, 128], sizes = [8, 128], strides = [1, 1]} : vector<8x384xf32> to vector<8x128xf32>
    %154 = vector.extract_strided_slice %144 {offsets = [0, 128], sizes = [8, 128], strides = [1, 1]} : vector<8x384xf32> to vector<8x128xf32>
    %155 = arith.addf %153, %154 : vector<8x128xf32>
    %156 = arith.negf %155 : vector<8x128xf32>
    %157 = math.exp %156 : vector<8x128xf32>
    %cst_143 = arith.constant 1.000000e+00 : f32
    %158 = vector.broadcast %cst_143 : f32 to vector<8x128xf32>
    %159 = arith.addf %158, %157 : vector<8x128xf32>
    %160 = arith.divf %158, %159 : vector<8x128xf32>
    %161 = vector.extract_strided_slice %141 {offsets = [0, 256], sizes = [8, 128], strides = [1, 1]} : vector<8x384xf32> to vector<8x128xf32>
    %162 = vector.extract_strided_slice %144 {offsets = [0, 256], sizes = [8, 128], strides = [1, 1]} : vector<8x384xf32> to vector<8x128xf32>
    %163 = arith.addf %162, %139 : vector<8x128xf32>
    %164 = arith.mulf %152, %163 : vector<8x128xf32>
    %165 = arith.addf %161, %164 : vector<8x128xf32>
    %166 = math.tanh %165 : vector<8x128xf32>
    %cst_144 = arith.constant 1.000000e+00 : f32
    %167 = vector.broadcast %cst_144 : f32 to vector<8x128xf32>
    %168 = arith.subf %167, %160 : vector<8x128xf32>
    %169 = arith.mulf %168, %166 : vector<8x128xf32>
    %170 = arith.mulf %160, %140 : vector<8x128xf32>
    %171 = arith.addf %169, %170 : vector<8x128xf32>
    %172 = arith.truncf %171 : vector<8x128xf32> to vector<8x128xbf16>
    %c0_145 = arith.constant 0 : index
    %c0_146 = arith.constant 0 : index
    %173 = vector.load %arg7[%c0_145, %c0_146] : memref<128x256xbf16, #tpu.memory_space<vmem>>, vector<128x256xbf16>
    %cst_147 = arith.constant dense<0.000000e+00> : vector<8x256xf32>
    %174 = tpu.matmul %172, %173, %cst_147 {dimension_numbers = #tpu.dot_dimension_numbers<[1], [0], [0], [1], [0, 0, 1, 1], [], []>} : vector<8x128xbf16>, vector<128x256xbf16>, vector<8x256xf32> -> vector<8x256xf32>
    %c0_148 = arith.constant 0 : index
    %c0_149 = arith.constant 0 : index
    %175 = vector.load %arg8[%c0_148, %c0_149] : memref<1x256xf32, #tpu.memory_space<vmem>>, vector<1x256xf32>
    %176 = vector.broadcast %175 : vector<1x256xf32> to vector<8x256xf32>
    %177 = arith.addf %174, %176 : vector<8x256xf32>
    %c0_150 = arith.constant 0 : index
    %c0_151 = arith.constant 0 : index
    %178 = vector.load %arg9[%c0_150, %c0_151] : memref<8x256xf32, #tpu.memory_space<vmem>>, vector<8x256xf32>
    tpu.vector_store %arg9[%c0_150, %c0_151], %177 {strides = array<i32>} : memref<8x256xf32, #tpu.memory_space<vmem>>, vector<8x256xf32>,
    %179 = vector.extract_strided_slice %136 {offsets = [8, 0], sizes = [8, 384], strides = [1, 1]} : vector<32x384xf32> to vector<8x384xf32>
    %180 = arith.truncf %171 : vector<8x128xf32> to vector<8x128xbf16>
    %c0_152 = arith.constant 0 : index
    %c0_153 = arith.constant 0 : index
    %181 = vector.load %arg4[%c0_152, %c0_153] : memref<128x384xbf16, #tpu.memory_space<vmem>>, vector<128x384xbf16>
    %cst_154 = arith.constant dense<0.000000e+00> : vector<8x384xf32>
    %182 = tpu.matmul %180, %181, %cst_154 {dimension_numbers = #tpu.dot_dimension_numbers<[1], [0], [0], [1], [0, 0, 1, 1], [], []>} : vector<8x128xbf16>, vector<128x384xbf16>, vector<8x384xf32> -> vector<8x384xf32>
    %183 = vector.extract_strided_slice %179 {offsets = [0, 0], sizes = [8, 128], strides = [1, 1]} : vector<8x384xf32> to vector<8x128xf32>
    %184 = vector.extract_strided_slice %182 {offsets = [0, 0], sizes = [8, 128], strides = [1, 1]} : vector<8x384xf32> to vector<8x128xf32>
    %185 = arith.addf %183, %184 : vector<8x128xf32>
    %186 = arith.negf %185 : vector<8x128xf32>
    %187 = math.exp %186 : vector<8x128xf32>
    %cst_155 = arith.constant 1.000000e+00 : f32
    %188 = vector.broadcast %cst_155 : f32 to vector<8x128xf32>
    %189 = arith.addf %188, %187 : vector<8x128xf32>
    %190 = arith.divf %188, %189 : vector<8x128xf32>
    %191 = vector.extract_strided_slice %179 {offsets = [0, 128], sizes = [8, 128], strides = [1, 1]} : vector<8x384xf32> to vector<8x128xf32>
    %192 = vector.extract_strided_slice %182 {offsets = [0, 128], sizes = [8, 128], strides = [1, 1]} : vector<8x384xf32> to vector<8x128xf32>
    %193 = arith.addf %191, %192 : vector<8x128xf32>
    %194 = arith.negf %193 : vector<8x128xf32>
    %195 = math.exp %194 : vector<8x128xf32>
    %cst_156 = arith.constant 1.000000e+00 : f32
    %196 = vector.broadcast %cst_156 : f32 to vector<8x128xf32>
    %197 = arith.addf %196, %195 : vector<8x128xf32>
    %198 = arith.divf %196, %197 : vector<8x128xf32>
    %199 = vector.extract_strided_slice %179 {offsets = [0, 256], sizes = [8, 128], strides = [1, 1]} : vector<8x384xf32> to vector<8x128xf32>
    %200 = vector.extract_strided_slice %182 {offsets = [0, 256], sizes = [8, 128], strides = [1, 1]} : vector<8x384xf32> to vector<8x128xf32>
    %201 = arith.addf %200, %139 : vector<8x128xf32>
    %202 = arith.mulf %190, %201 : vector<8x128xf32>
    %203 = arith.addf %199, %202 : vector<8x128xf32>
    %204 = math.tanh %203 : vector<8x128xf32>
    %cst_157 = arith.constant 1.000000e+00 : f32
    %205 = vector.broadcast %cst_157 : f32 to vector<8x128xf32>
    %206 = arith.subf %205, %198 : vector<8x128xf32>
    %207 = arith.mulf %206, %204 : vector<8x128xf32>
    %208 = arith.mulf %198, %171 : vector<8x128xf32>
    %209 = arith.addf %207, %208 : vector<8x128xf32>
    %210 = vector.extract_strided_slice %136 {offsets = [16, 0], sizes = [8, 384], strides = [1, 1]} : vector<32x384xf32> to vector<8x384xf32>
    %211 = arith.truncf %209 : vector<8x128xf32> to vector<8x128xbf16>
    %c0_158 = arith.constant 0 : index
    %c0_159 = arith.constant 0 : index
    %212 = vector.load %arg4[%c0_158, %c0_159] : memref<128x384xbf16, #tpu.memory_space<vmem>>, vector<128x384xbf16>
    %cst_160 = arith.constant dense<0.000000e+00> : vector<8x384xf32>
    %213 = tpu.matmul %211, %212, %cst_160 {dimension_numbers = #tpu.dot_dimension_numbers<[1], [0], [0], [1], [0, 0, 1, 1], [], []>} : vector<8x128xbf16>, vector<128x384xbf16>, vector<8x384xf32> -> vector<8x384xf32>
    %214 = vector.extract_strided_slice %210 {offsets = [0, 0], sizes = [8, 128], strides = [1, 1]} : vector<8x384xf32> to vector<8x128xf32>
    %215 = vector.extract_strided_slice %213 {offsets = [0, 0], sizes = [8, 128], strides = [1, 1]} : vector<8x384xf32> to vector<8x128xf32>
    %216 = arith.addf %214, %215 : vector<8x128xf32>
    %217 = arith.negf %216 : vector<8x128xf32>
    %218 = math.exp %217 : vector<8x128xf32>
    %cst_161 = arith.constant 1.000000e+00 : f32
    %219 = vector.broadcast %cst_161 : f32 to vector<8x128xf32>
    %220 = arith.addf %219, %218 : vector<8x128xf32>
    %221 = arith.divf %219, %220 : vector<8x128xf32>
    %222 = vector.extract_strided_slice %210 {offsets = [0, 128], sizes = [8, 128], strides = [1, 1]} : vector<8x384xf32> to vector<8x128xf32>
    %223 = vector.extract_strided_slice %213 {offsets = [0, 128], sizes = [8, 128], strides = [1, 1]} : vector<8x384xf32> to vector<8x128xf32>
    %224 = arith.addf %222, %223 : vector<8x128xf32>
    %225 = arith.negf %224 : vector<8x128xf32>
    %226 = math.exp %225 : vector<8x128xf32>
    %cst_162 = arith.constant 1.000000e+00 : f32
    %227 = vector.broadcast %cst_162 : f32 to vector<8x128xf32>
    %228 = arith.addf %227, %226 : vector<8x128xf32>
    %229 = arith.divf %227, %228 : vector<8x128xf32>
    %230 = vector.extract_strided_slice %210 {offsets = [0, 256], sizes = [8, 128], strides = [1, 1]} : vector<8x384xf32> to vector<8x128xf32>
    %231 = vector.extract_strided_slice %213 {offsets = [0, 256], sizes = [8, 128], strides = [1, 1]} : vector<8x384xf32> to vector<8x128xf32>
    %232 = arith.addf %231, %139 : vector<8x128xf32>
    %233 = arith.mulf %221, %232 : vector<8x128xf32>
    %234 = arith.addf %230, %233 : vector<8x128xf32>
    %235 = math.tanh %234 : vector<8x128xf32>
    %cst_163 = arith.constant 1.000000e+00 : f32
    %236 = vector.broadcast %cst_163 : f32 to vector<8x128xf32>
    %237 = arith.subf %236, %229 : vector<8x128xf32>
    %238 = arith.mulf %237, %235 : vector<8x128xf32>
    %239 = arith.mulf %229, %209 : vector<8x128xf32>
    %240 = arith.addf %238, %239 : vector<8x128xf32>
    %241 = vector.extract_strided_slice %136 {offsets = [24, 0], sizes = [8, 384], strides = [1, 1]} : vector<32x384xf32> to vector<8x384xf32>
    %242 = arith.truncf %240 : vector<8x128xf32> to vector<8x128xbf16>
    %c0_164 = arith.constant 0 : index
    %c0_165 = arith.constant 0 : index
    %243 = vector.load %arg4[%c0_164, %c0_165] : memref<128x384xbf16, #tpu.memory_space<vmem>>, vector<128x384xbf16>
    %cst_166 = arith.constant dense<0.000000e+00> : vector<8x384xf32>
    %244 = tpu.matmul %242, %243, %cst_166 {dimension_numbers = #tpu.dot_dimension_numbers<[1], [0], [0], [1], [0, 0, 1, 1], [], []>} : vector<8x128xbf16>, vector<128x384xbf16>, vector<8x384xf32> -> vector<8x384xf32>
    %245 = vector.extract_strided_slice %241 {offsets = [0, 0], sizes = [8, 128], strides = [1, 1]} : vector<8x384xf32> to vector<8x128xf32>
    %246 = vector.extract_strided_slice %244 {offsets = [0, 0], sizes = [8, 128], strides = [1, 1]} : vector<8x384xf32> to vector<8x128xf32>
    %247 = arith.addf %245, %246 : vector<8x128xf32>
    %248 = arith.negf %247 : vector<8x128xf32>
    %249 = math.exp %248 : vector<8x128xf32>
    %cst_167 = arith.constant 1.000000e+00 : f32
    %250 = vector.broadcast %cst_167 : f32 to vector<8x128xf32>
    %251 = arith.addf %250, %249 : vector<8x128xf32>
    %252 = arith.divf %250, %251 : vector<8x128xf32>
    %253 = vector.extract_strided_slice %241 {offsets = [0, 128], sizes = [8, 128], strides = [1, 1]} : vector<8x384xf32> to vector<8x128xf32>
    %254 = vector.extract_strided_slice %244 {offsets = [0, 128], sizes = [8, 128], strides = [1, 1]} : vector<8x384xf32> to vector<8x128xf32>
    %255 = arith.addf %253, %254 : vector<8x128xf32>
    %256 = arith.negf %255 : vector<8x128xf32>
    %257 = math.exp %256 : vector<8x128xf32>
    %cst_168 = arith.constant 1.000000e+00 : f32
    %258 = vector.broadcast %cst_168 : f32 to vector<8x128xf32>
    %259 = arith.addf %258, %257 : vector<8x128xf32>
    %260 = arith.divf %258, %259 : vector<8x128xf32>
    %261 = vector.extract_strided_slice %241 {offsets = [0, 256], sizes = [8, 128], strides = [1, 1]} : vector<8x384xf32> to vector<8x128xf32>
    %262 = vector.extract_strided_slice %244 {offsets = [0, 256], sizes = [8, 128], strides = [1, 1]} : vector<8x384xf32> to vector<8x128xf32>
    %263 = arith.addf %262, %139 : vector<8x128xf32>
    %264 = arith.mulf %252, %263 : vector<8x128xf32>
    %265 = arith.addf %261, %264 : vector<8x128xf32>
    %266 = math.tanh %265 : vector<8x128xf32>
    %cst_169 = arith.constant 1.000000e+00 : f32
    %267 = vector.broadcast %cst_169 : f32 to vector<8x128xf32>
    %268 = arith.subf %267, %260 : vector<8x128xf32>
    %269 = arith.mulf %268, %266 : vector<8x128xf32>
    %270 = arith.mulf %260, %240 : vector<8x128xf32>
    %271 = arith.addf %269, %270 : vector<8x128xf32>
    %c0_170 = arith.constant 0 : index
    %c0_171 = arith.constant 0 : index
    %272 = vector.load %arg10[%c0_170, %c0_171] : memref<8x128xf32, #tpu.memory_space<vmem>>, vector<8x128xf32>
    tpu.vector_store %arg10[%c0_170, %c0_171], %271 {strides = array<i32>} : memref<8x128xf32, #tpu.memory_space<vmem>>, vector<8x128xf32>,
    return
  }
}

</mosaic_0001>

<bundles_post_ra>
// kernel: decoder_rnn_forward.1
= control target key start
LH: loop header
LB: loop body
LE: loop exit
PB: predicated region body
PF: predicated region fallthrough
CT: control target
= control target key end

     0   :  { %16 = vsyncpa [#allocation6], 0  ;;  %s2492_s0 = inlined_call_operand.vmem [shape: s32[4,8], index: 0, kind: input, shape index: {}]   ;;  %s2493_s1 = inlined_call_operand.hbm [shape: f32[256,128], index: 1, kind: input, shape index: {}]   ;;  %s2494_s2 = inlined_call_operand.vmem [shape: f32[8,128], index: 2, kind: input, shape index: {}]   ;;  %s2495_s3 = inlined_call_operand.hbm [shape: bf16[128,384], index: 3, kind: input, shape index: {}]   ;;  %s2496_s4 = inlined_call_operand.hbm [shape: bf16[128,384], index: 4, kind: input, shape index: {}]   ;;  %s2497_s5 = inlined_call_operand.vmem [shape: f32[1,384], index: 5, kind: input, shape index: {}]   ;;  %s2498_s6 = inlined_call_operand.vmem [shape: f32[1,128], index: 6, kind: input, shape index: {}]   ;;  %s2499_s7 = inlined_call_operand.hbm [shape: bf16[128,256], index: 7, kind: input, shape index: {}]   ;;  %s2500_s8 = inlined_call_operand.hbm [shape: f32[1,256], index: 8, kind: input, shape index: {}]   ;;  %s2501_s9 = inlined_call_operand.hbm [shape: f32[8,256], index: 9, kind: output, shape index: {0}]   ;;  %s2502_s10 = inlined_call_operand.hbm [shape: f32[8,128], index: 10, kind: output, shape index: {1}]  }
   0x1   :  { %17 = vsyncpa [#allocation4], 0 }
   0x2   :  { %18 = vsyncpa [#allocation9], 0 }
   0x3   :  { %19 = vsyncpa [#allocation12], 0 }
   0x4   :  { %20 = vsyncpa [#allocation5], 0 }
   0x5   :  { %21 = vsyncpa [#allocation16], 0  ;;  %s2082_s13 = smov [#allocation8]  }
   0x6   :  { %s51_s14 = sshll.u32 %s2082_s13, 4  ;;  %s52_s14 = int_to_ptr.vmem [resolvable:$true] %s51_s14 }
   0x7   :  { %s1926_s15 = scalar_lea.vmem %s52_s14, 3072  ;;  %p1931_p1 = scmp.lt.s32.totalorder %s52_s14, %s52_s14 }
   0x8   :  { %p1927_p0 = scmp.ne.s32.totalorder %s52_s14, %s1926_s15  ;;  %p1932_p2 = scmp.lt.s32.totalorder %s1926_s15, %s1926_s15 }
   0xa   :  { %p1933_p3 = por %p1932_p2, %p1931_p1 }
   0xc   :  { %p1934_p4 = pnand %p1933_p3, %p1927_p0 }
   0xe   :  { %1937 = shalt.err (!%p1934_p4)
}
   0xf   :  { %s2083_s16 = smov 192   ;;  %s2084_s17 = smov 12  }
  0x10   :  { %57 = dma.hbm_to_vmem [thread:$0]  %s2495_s3, 3072, %s52_s14, [#allocation9], %s2083_s16, %s2083_s16, %s2084_s17  }
  0x11   :  { %s2085_s20 = smov [#allocation11]   ;;  %s28_s24 = sshll.u32 %s2492_s0, 4  ;;  %s29_s24 = int_to_ptr.vmem [resolvable:$true] %s28_s24 }
  0x12   :  { %s79_s21 = sshll.u32 %s2085_s20, 4  ;;  %s80_s21 = int_to_ptr.vmem [resolvable:$true] %s79_s21 }
  0x13   :  { %s1946_s25 = scalar_lea.vmem %s80_s21, 2048  ;;  %p1951_p6 = scmp.lt.s32.totalorder %s80_s21, %s80_s21 }
  0x14   :  { %p1947_p5 = scmp.ne.s32.totalorder %s80_s21, %s1946_s25  ;;  %p1952_p7 = scmp.lt.s32.totalorder %s1946_s25, %s1946_s25 }
  0x16   :  { %p1953_p8 = por %p1952_p7, %p1951_p6 }
  0x18   :  { %p1954_p9 = pnand %p1953_p8, %p1947_p5 }
  0x1a   :  { %1957 = shalt.err (!%p1954_p9)
}
  0x1b   :  { %s2086_s26 = smov 128   ;;  %s2087_s27 = smov 8  }
  0x1c   :  { %85 = dma.hbm_to_vmem [thread:$0]  %s2499_s7, 2048, %s80_s21, [#allocation12], %s2086_s26, %s2086_s26, %s2087_s27  }
  0x1d   :  { %s1958_s3 = scalar_lea.vmem %s29_s24, 64  ;;  %p1963_p11 = scmp.lt.s32.totalorder %s29_s24, %s29_s24 }
  0x1e   :  { %p1959_p10 = scmp.ne.s32.totalorder %s29_s24, %s1958_s3  ;;  %p1964_p12 = scmp.lt.s32.totalorder %s1958_s3, %s1958_s3 }
  0x20   :  { %p1965_p13 = por %p1964_p12, %p1963_p11 }
  0x22   :  { %p1966_p0 = pnand %p1965_p13, %p1959_p10 }
  0x24   :  { %1969 = shalt.err (!%p1966_p0)
}
  0x25   :  { %s2088_s0 = smov [#allocation3]   ;;  %s2089_s30 = smov [#allocation7]  }
  0x26   :  { %31 = dma.vmem_to_smem %s29_s24, 64, %s2088_s0, [#allocation6]  }
  0x27   :  { %s37_s11 = sshll.u32 %s2089_s30, 4  ;;  %s2090_s12 = smov [#allocation10]   ;;  %s38_s11 = int_to_ptr.vmem [resolvable:$true] %s37_s11 }
  0x28   :  { %s63_s13 = sshll.u32 %s2090_s12, 4  ;;  %s1978_s14 = scalar_lea.vmem %s38_s11, 4096  ;;  %s64_s13 = int_to_ptr.vmem [resolvable:$true] %s63_s13 }
  0x29   :  { %p1979_p1 = scmp.ne.s32.totalorder %s38_s11, %s1978_s14  ;;  %p1983_p2 = scmp.lt.s32.totalorder %s38_s11, %s38_s11 }
  0x2a   :  { %p1984_p3 = scmp.lt.s32.totalorder %s1978_s14, %s1978_s14 }
  0x2c   :  { %p1985_p4 = por %p1984_p3, %p1983_p2 }
  0x2e   :  { %p1986_p5 = pnand %p1985_p4, %p1979_p1 }
  0x30   :  { %1989 = shalt.err (!%p1986_p5)
}
  0x31   :  { %43 = dma.hbm_to_vmem [thread:$0]  %s2493_s1, 4096, %s38_s11, [#allocation4], %s2086_s26, %s2086_s26, %s2087_s27  }
  0x32   :  { %s1998_s18 = scalar_lea.vmem %s64_s13, 3072  ;;  %p2003_p7 = scmp.lt.s32.totalorder %s64_s13, %s64_s13 }
  0x33   :  { %p1999_p6 = scmp.ne.s32.totalorder %s64_s13, %s1998_s18  ;;  %p2004_p8 = scmp.lt.s32.totalorder %s1998_s18, %s1998_s18 }
  0x35   :  { %p2005_p9 = por %p2004_p8, %p2003_p7 }
  0x37   :  { %p2006_p10 = pnand %p2005_p9, %p1999_p6 }
  0x39   :  { %2009 = shalt.err (!%p2006_p10)
}
  0x3a   :  { %69 = dma.hbm_to_vmem [thread:$0]  %s2496_s4, 3072, %s64_s13, [#allocation9], %s2083_s16, %s2083_s16, %s2084_s17  }
  0x3b   :  { %s2091_s21 = smov [#allocation13]  }
  0x3c   :  { %s92_s22 = sshll.u32 %s2091_s21, 4  ;;  %s93_s22 = int_to_ptr.vmem [resolvable:$true] %s92_s22 }
  0x3d   :  { %s2018_s23 = scalar_lea.vmem %s93_s22, 32  ;;  %p2023_p12 = scmp.lt.s32.totalorder %s93_s22, %s93_s22 }
  0x3e   :  { %p2019_p11 = scmp.ne.s32.totalorder %s93_s22, %s2018_s23  ;;  %p2024_p13 = scmp.lt.s32.totalorder %s2018_s23, %s2018_s23 }
  0x40   :  { %p2025_p0 = por %p2024_p13, %p2023_p12 }
  0x42   :  { %p2026_p1 = pnand %p2025_p0, %p2019_p11 }
  0x44   :  { %2029 = shalt.err (!%p2026_p1)
}
  0x45   :  { %95 = dma.hbm_to_vmem [thread:$0]  %s2500_s8, 32, %s93_s22, [#allocation12]  }
  0x46   :  { %2070 = dma.done.wait [#allocation6], 64  }
  0x47   :  { %2071 = vsyncadd [#allocation6], 4294967232 }
  0x48   :  { %2072 = dma.done.wait [#allocation4], 4096  }
  0x49   :  { %2073 = vsyncadd [#allocation4], 4294963200 }
  0x4a   :  { %2074 = dma.done.wait [#allocation9], 6144  }
  0x4b   :  { %2075 = vsyncadd [#allocation9], 4294961152 }
  0x4c   :  { %2076 = dma.done.wait [#allocation12], 2080  }
  0x4d   :  { %2077 = vsyncadd [#allocation12], 4294965216 }
  0x4e   :  { %114 = sfence }
  0x4f   :  { %v1782_v0 = vld [vmem:[#allocation8 + $0xac] ss:$12 sps:$4 sm:$0xff]   ;;  %v1784_v1 = vld [vmem:[#allocation8 + $0xa8] ss:$12 sps:$4 sm:$0xff]   ;;  %v2092_v2 = vmov 0   ;;  %s116_s4 = sld [smem:[#allocation3]] }
  0x50   :  { %463 = vmatprep.mubr.bf16.mxu0 %v2092_v2  ;;  %431 = vmatprep.subr.bf16.mxu0 %v1782_v0  ;;  %v1785_v3 = vld [vmem:[#allocation8 + $0x94] ss:$12 sps:$4 sm:$0xff]   ;;  %v1787_v4 = vld [vmem:[#allocation8 + $0x90] ss:$12 sps:$4 sm:$0xff]   ;;  %s1493_s8 = sld [smem:[#allocation3 + $0x1]]  ;;  %v2093_v60 = vmov 0.0  }
  0x51   :  { %432 = vmatpush1.bf16.msra.mxu0 %v1784_v1  ;;  %v1788_v5 = vld [vmem:[#allocation8 + $0x7c] ss:$12 sps:$4 sm:$0xff]   ;;  %s1494_s16 = sld [smem:[#allocation3 + $0x2]]  ;;  %v1790_v6 = vld [vmem:[#allocation8 + $0x78] ss:$12 sps:$4 sm:$0xff]   ;;  %vm2094_vm0 = vmmov 0  }
  0x52   :  { %433 = vmatprep.subr.bf16.mxu0 %v1785_v3  ;;  %v1791_v7 = vld [vmem:[#allocation8 + $0x64] ss:$12 sps:$4 sm:$0xff]   ;;  %s1495_s17 = sld [smem:[#allocation3 + $0x3]]  ;;  %v1793_v9 = vld [vmem:[#allocation8 + $0x60] ss:$12 sps:$4 sm:$0xff]  }
  0x53   :  { %v1803_v8 = vld [vmem:[#allocation8 + $0xb0] ss:$12 sps:$4 sm:$0xff]   ;;  %v1794_v10 = vld [vmem:[#allocation8 + $0x4c] ss:$12 sps:$4 sm:$0xff]   ;;  %s1496_s27 = sld [smem:[#allocation3 + $0x4]] }
  0x54   :  { %1667 = vmatprep.subr.bf16.mxu1 %v1803_v8  ;;  %v1807_v11 = vld [vmem:[#allocation8 + $0x98] ss:$12 sps:$4 sm:$0xff]   ;;  %s1497_s29 = sld [smem:[#allocation3 + $0x5]]  ;;  %v1796_v15 = vld [vmem:[#allocation8 + $0x48] ss:$12 sps:$4 sm:$0xff]  }
  0x55   :  { %434 = vmatpush1.bf16.msra.mxu0 %v1787_v4  ;;  %s117_s25 = scalar_lea.vmem [#allocation7], %s116_s4  ;;  %1668 = vmatpush3.bf16.msra.mxu1 %v1803_v8  ;;  %s1498_s0 = sld [smem:[#allocation3 + $0x6]]  ;;  %v1797_v17 = vld [vmem:[#allocation8 + $0x34] ss:$12 sps:$4 sm:$0xff]   ;;  %v1799_v19 = vld [vmem:[#allocation8 + $0x30] ss:$12 sps:$4 sm:$0xff]  }
  0x56   :  { %435 = vmatprep.subr.bf16.mxu0 %v1788_v5  ;;  %v118_v12 = vld [vmem:[%s117_s25] sm:$0x1]  ;;  %s121_s26 = scalar_lea.vmem [#allocation7], %s1493_s8  ;;  %1669 = vmatprep.subr.bf16.mxu1 %v1807_v11  ;;  %s1499_s30 = sld [smem:[#allocation3 + $0x7]]  ;;  %v1800_v20 = vld [vmem:[#allocation8 + $0x1c] ss:$12 sps:$4 sm:$0xff]  }
  0x57   :  { %119 = vst [vmem:[#allocation2] sm:$0x1] %v118_v12  ;;  %v122_v13 = vld [vmem:[%s121_s26] sm:$0x1]  ;;  %s125_s28 = scalar_lea.vmem [#allocation7], %s1494_s16  ;;  %s2177_s11 = sld [smem:[#allocation3 + $0x80]] }
  0x58   :  { %123 = vst [vmem:[#allocation2 + $0x1] sm:$0x1] %v122_v13  ;;  %v126_v14 = vld [vmem:[%s125_s28] sm:$0x1]  ;;  %s129_s3 = scalar_lea.vmem [#allocation7], %s1495_s17  ;;  %s2179_s12 = sld [smem:[#allocation3 + $0x81]] }
  0x59   :  { %436 = vmatpush1.bf16.msra.mxu0 %v1790_v6  ;;  %127 = vst [vmem:[#allocation2 + $0x2] sm:$0x1] %v126_v14  ;;  %v130_v16 = vld [vmem:[%s129_s3] sm:$0x1]  ;;  %1670 = vmatpush3.bf16.msra.mxu1 %v1807_v11  ;;  %s2181_s13 = sld [smem:[#allocation3 + $0x82]]  ;;  %s133_s14 = scalar_lea.vmem [#allocation7], %s1496_s27 }
  0x5a   :  { %437 = vmatprep.subr.bf16.mxu0 %v1791_v7  ;;  %131 = vst [vmem:[#allocation2 + $0x3] sm:$0x1] %v130_v16  ;;  %v1811_v18 = vld [vmem:[#allocation8 + $0x80] ss:$12 sps:$4 sm:$0xff]   ;;  %s2183_s7 = sld [smem:[#allocation3 + $0x83]]  ;;  %s137_s15 = scalar_lea.vmem [#allocation7], %s1497_s29 }
  0x5b   :  { %1671 = vmatprep.subr.bf16.mxu1 %v1811_v18  ;;  %v134_v21 = vld [vmem:[%s133_s14] sm:$0x1]  ;;  %v1802_v22 = vld [vmem:[#allocation8 + $0x18] ss:$12 sps:$4 sm:$0xff]   ;;  %s2185_s18 = sld [smem:[#allocation3 + $0x84]]  ;;  %s141_s19 = scalar_lea.vmem [#allocation7], %s1498_s0 }
  0x5c   :  { %135 = vst [vmem:[#allocation2 + $0x4] sm:$0x1] %v134_v21  ;;  %v138_v23 = vld [vmem:[%s137_s15] sm:$0x1]  ;;  %v1804_v24 = vld [vmem:[#allocation8 + $0x4] ss:$12 sps:$4 sm:$0xff]  }
  0x5d   :  { %438 = vmatpush1.bf16.msra.mxu0 %v1793_v9  ;;  %1672 = vmatpush3.bf16.msra.mxu1 %v1811_v18  ;;  %139 = vst [vmem:[#allocation2 + $0x5] sm:$0x1] %v138_v23  ;;  %v142_v25 = vld [vmem:[%s141_s19] sm:$0x1]  ;;  %s2187_s20 = sld [smem:[#allocation3 + $0x85]]  ;;  %s145_s21 = scalar_lea.vmem [#allocation7], %s1499_s30 }
  0x5e   :  { %439 = vmatprep.subr.bf16.mxu0 %v1794_v10  ;;  %143 = vst [vmem:[#allocation2 + $0x6] sm:$0x1] %v142_v25  ;;  %v146_v26 = vld [vmem:[%s145_s21] sm:$0x1]  ;;  %s2189_s22 = sld [smem:[#allocation3 + $0x86]]  ;;  %s149_s23 = scalar_lea.vmem [#allocation7], %s2177_s11 }
  0x5f   :  { %147 = vst [vmem:[#allocation2 + $0x7] sm:$0x1] %v146_v26  ;;  %v150_v27 = vld [vmem:[%s149_s23] sm:$0x1]  ;;  %s2192_s1 = sld [smem:[#allocation3 + $0x87]]  ;;  %s153_s24 = scalar_lea.vmem [#allocation7], %s2179_s12 }
  0x60   :  { %v1806_v28 = vld [vmem:[#allocation8] ss:$12 sps:$4 sm:$0xff]   ;;  %151 = vst [vmem:[#allocation2 + $0x8] sm:$0x1] %v150_v27  ;;  %s157_s4 = scalar_lea.vmem [#allocation7], %s2181_s13  ;;  %s161_s8 = scalar_lea.vmem [#allocation7], %s2183_s7 }
  0x61   :  { %440 = vmatpush1.bf16.msra.mxu0 %v1796_v15  ;;  %v154_v29 = vld [vmem:[%s153_s24] sm:$0x1]  ;;  %v1815_v32 = vld [vmem:[#allocation8 + $0x68] ss:$12 sps:$4 sm:$0xff]   ;;  %s165_s16 = scalar_lea.vmem [#allocation7], %s2185_s18  ;;  %s1508_s27 = sld [smem:[#allocation3 + $0x100]] }
  0x62   :  { %441 = vmatprep.subr.bf16.mxu0 %v1797_v17  ;;  %155 = vst [vmem:[#allocation2 + $0x9] sm:$0x1] %v154_v29  ;;  %v158_v30 = vld [vmem:[%s157_s4] sm:$0x1]  ;;  %v2198_v34 = vld [vmem:[#allocation10 + $0xac] ss:$12 sps:$4 sm:$0xff]   ;;  %1673 = vmatprep.subr.bf16.mxu1 %v1815_v32 }
  0x63   :  { %159 = vst [vmem:[#allocation2 + $0xa] sm:$0x1] %v158_v30  ;;  %v162_v31 = vld [vmem:[%s161_s8] sm:$0x1]  ;;  %s169_s17 = scalar_lea.vmem [#allocation7], %s2187_s20  ;;  %1674 = vmatpush3.bf16.msra.mxu1 %v1815_v32  ;;  %s1509_s28 = sld [smem:[#allocation3 + $0x101]] }
  0x64   :  { %163 = vst [vmem:[#allocation2 + $0xb] sm:$0x1] %v162_v31  ;;  %v166_v33 = vld [vmem:[%s165_s16] sm:$0x1]  ;;  %s173_s25 = scalar_lea.vmem [#allocation7], %s2189_s22  ;;  %s1510_s29 = sld [smem:[#allocation3 + $0x102]] }
  0x65   :  { %442 = vmatpush1.bf16.msra.mxu0 %v1799_v19  ;;  %167 = vst [vmem:[#allocation2 + $0xc] sm:$0x1] %v166_v33  ;;  %v170_v35 = vld [vmem:[%s169_s17] sm:$0x1]  ;;  %s177_s26 = scalar_lea.vmem [#allocation7], %s2192_s1  ;;  %s2204_s3 = sld [smem:[#allocation3 + $0x103]] }
  0x66   :  { %443 = vmatprep.subr.bf16.mxu0 %v1800_v20  ;;  %171 = vst [vmem:[#allocation2 + $0xd] sm:$0x1] %v170_v35  ;;  %v174_v36 = vld [vmem:[%s173_s25] sm:$0x1]  ;;  %v1819_v38 = vld [vmem:[#allocation8 + $0x50] ss:$12 sps:$4 sm:$0xff]  }
  0x67   :  { %175 = vst [vmem:[#allocation2 + $0xe] sm:$0x1] %v174_v36  ;;  %v178_v37 = vld [vmem:[%s177_s26] sm:$0x1]  ;;  %1675 = vmatprep.subr.bf16.mxu1 %v1819_v38  ;;  %v1823_v40 = vld [vmem:[#allocation8 + $0x38] ss:$12 sps:$4 sm:$0xff]  }
  0x68   :  { %179 = vst [vmem:[#allocation2 + $0xf] sm:$0x1] %v178_v37  ;;  %v244_v39 = vld [vmem:[#allocation2] sm:$0xff]  ;;  %1676 = vmatpush3.bf16.msra.mxu1 %v1819_v38  ;;  %v2206_v44 = vld [vmem:[#allocation10 + $0xa8] ss:$12 sps:$4 sm:$0xff]   ;;  %s2208_s0 = sld [smem:[#allocation3 + $0x104]] }
  0x69   :  { %444 = vmatpush1.bf16.msra.mxu0 %v1802_v22  ;;  %1677 = vmatprep.subr.bf16.mxu1 %v1823_v40  ;;  %v1827_v41 = vld [vmem:[#allocation8 + $0x20] ss:$12 sps:$4 sm:$0xff]   ;;  %v248_v42 = vmax.f32 %v244_v39, 0.0  ;;  %s2212_s30 = sld [smem:[#allocation3 + $0x105]]  ;;  %v1831_v47 = vld [vmem:[#allocation8 + $0x8] ss:$12 sps:$4 sm:$0xff]  }
  0x6a   :  { %445 = vmatprep.subr.bf16.mxu0 %v1804_v24  ;;  %v2210_v46 = vld [vmem:[#allocation10 + $0x94] ss:$12 sps:$4 sm:$0xff]   ;;  %s2214_s11 = sld [smem:[#allocation3 + $0x106]]  ;;  %s181_s12 = scalar_lea.vmem [#allocation7], %s1508_s27  ;;  %v2218_v50 = vld [vmem:[#allocation10 + $0x90] ss:$12 sps:$4 sm:$0xff]  }
  0x6b   :  { %v182_v49 = vld [vmem:[%s181_s12] sm:$0x1]  ;;  %s2216_s13 = sld [smem:[#allocation3 + $0x107]]  ;;  %s185_s14 = scalar_lea.vmem [#allocation7], %s1509_s28  ;;  %v2222_v52 = vld [vmem:[#allocation10 + $0x7c] ss:$12 sps:$4 sm:$0xff]  }
  0x6c   :  { %1678 = vmatpush3.bf16.msra.mxu1 %v1823_v40  ;;  %183 = vst [vmem:[#allocation2 + $0x10] sm:$0x1] %v182_v49  ;;  %v186_v51 = vld [vmem:[%s185_s14] sm:$0x1]  ;;  %s2220_s7 = sld [smem:[#allocation3 + $0x180]]  ;;  %s189_s15 = scalar_lea.vmem [#allocation7], %s1510_s29 }
  0x6d   :  { %446 = vmatpush1.bf16.msra.mxu0 %v1806_v28  ;;  %1679 = vmatprep.subr.bf16.mxu1 %v1827_v41  ;;  %187 = vst [vmem:[#allocation2 + $0x11] sm:$0x1] %v186_v51  ;;  %v190_v53 = vld [vmem:[%s189_s15] sm:$0x1]  ;;  %s2224_s18 = sld [smem:[#allocation3 + $0x181]]  ;;  %s193_s19 = scalar_lea.vmem [#allocation7], %s2204_s3  ;;  %v288_v51 = vlaneseq }
  0x6e   :  { %702 = vmatprep.subr.bf16.mxu0 %v2198_v34  ;;  %191 = vst [vmem:[#allocation2 + $0x12] sm:$0x1] %v190_v53  ;;  %v194_v54 = vld [vmem:[%s193_s19] sm:$0x1]  ;;  %s2229_s20 = sld [smem:[#allocation3 + $0x182]]  ;;  %s197_s21 = scalar_lea.vmem [#allocation7], %s2208_s0 }
  0x6f   :  { %v245_v43 = vld [vmem:[#allocation2 + $0x8] sm:$0xff]  ;;  %195 = vst [vmem:[#allocation2 + $0x13] sm:$0x1] %v194_v54  ;;  %v198_v55 = vld [vmem:[%s197_s21] sm:$0x1]  ;;  %s2233_s22 = sld [smem:[#allocation3 + $0x183]] }
  0x70   :  { %v249_v45 = vmax.f32 %v245_v43, 0.0  ;;  %1680 = vmatpush3.bf16.msra.mxu1 %v1827_v41  ;;  %v2235_v56 = vld [vmem:[#allocation10 + $0x78] ss:$12 sps:$4 sm:$0xff]   ;;  %199 = vst [vmem:[#allocation2 + $0x14] sm:$0x1] %v198_v55  ;;  %s201_s23 = scalar_lea.vmem [#allocation7], %s2212_s30 }
  0x71   :  { %1681 = vmatprep.subr.bf16.mxu1 %v1831_v47  ;;  %v202_v57 = vld [vmem:[%s201_s23] sm:$0x1]  ;;  %s2238_s1 = sld [smem:[#allocation3 + $0x184]]  ;;  %v2240_v58 = vld [vmem:[#allocation10 + $0x64] ss:$12 sps:$4 sm:$0xff]   ;;  %s205_s24 = scalar_lea.vmem [#allocation7], %s2214_s11 }
  0x72   :  { %v252_v48 = vpack.c.bf16 %v249_v45, %v248_v42  ;;  %203 = vst [vmem:[#allocation2 + $0x15] sm:$0x1] %v202_v57  ;;  %v206_v59 = vld [vmem:[%s205_s24] sm:$0x1]  ;;  %s2243_s4 = sld [smem:[#allocation3 + $0x185]]  ;;  %s209_s8 = scalar_lea.vmem [#allocation7], %s2216_s13 }
  0x73   :  { %207 = vst [vmem:[#allocation2 + $0x16] sm:$0x1] %v206_v59  ;;  %v210_v61 = vld [vmem:[%s209_s8] sm:$0x1]  ;;  %s1522_s16 = sld [smem:[#allocation3 + $0x186]]  ;;  %s213_s17 = scalar_lea.vmem [#allocation7], %s2220_s7 }
  0x74   :  { %464 = vmatmul.mubr.bf16.vlgmr.msra.gmra.mxu0 %v252_v48  ;;  %1683 = vmatprep.mubr.bf16.mxu1 %v252_v48  ;;  %211 = vst [vmem:[#allocation2 + $0x17] sm:$0x1] %v210_v61  ;;  %v214_v62 = vld [vmem:[%s213_s17] sm:$0x1]  ;;  %s1523_s25 = sld [smem:[#allocation3 + $0x187]]  ;;  %s217_s26 = scalar_lea.vmem [#allocation7], %s2224_s18 }
  0x75   :  { %703 = vmatpush1.bf16.msra.mxu0 %v2206_v44  ;;  %473 = vmatprep.mubr.bf16.mxu0 %v2092_v2  ;;  %215 = vst [vmem:[#allocation2 + $0x18] sm:$0x1] %v214_v62  ;;  %v218_v63 = vld [vmem:[%s217_s26] sm:$0x1]  ;;  %s221_s27 = scalar_lea.vmem [#allocation7], %s2229_s20  ;;  %s225_s28 = scalar_lea.vmem [#allocation7], %s2233_s22 }
  0x76   :  { %704 = vmatprep.subr.bf16.mxu0 %v2210_v46  ;;  %1682 = vmatpush3.bf16.msra.mxu1 %v1831_v47  ;;  %219 = vst [vmem:[#allocation2 + $0x19] sm:$0x1] %v218_v63  ;;  %v222_v0 = vld [vmem:[%s221_s27] sm:$0x1]  ;;  %v2257_v4 = vld [vmem:[#allocation10 + $0x4c] ss:$12 sps:$4 sm:$0xff]  }
  0x77   :  { %1687 = vmatprep.subr.bf16.mxu1 %v2093_v60  ;;  %v2253_v1 = vld [vmem:[#allocation10 + $0x60] ss:$12 sps:$4 sm:$0xff]   ;;  %223 = vst [vmem:[#allocation2 + $0x1a] sm:$0x1] %v222_v0  ;;  %s229_s29 = scalar_lea.vmem [#allocation7], %s2238_s1  ;;  %v2321_v53 = vshrl.u32 %v288_v51, 7 }
  0x78   :  { %v226_v3 = vld [vmem:[%s225_s28] sm:$0x1]  ;;  %s233_s3 = scalar_lea.vmem [#allocation7], %s2243_s4  ;;  %v2262_v8 = vld [vmem:[#allocation10 + $0x48] ss:$12 sps:$4 sm:$0xff]  }
  0x79   :  { %705 = vmatpush1.bf16.msra.mxu0 %v2218_v50  ;;  %227 = vst [vmem:[#allocation2 + $0x1b] sm:$0x1] %v226_v3  ;;  %v230_v5 = vld [vmem:[%s229_s29] sm:$0x1]  ;;  %s237_s0 = scalar_lea.vmem [#allocation7], %s1522_s16  ;;  %v290_v54 = vsub.s32 0, %v2321_v53 }
  0x7a   :  { %706 = vmatprep.subr.bf16.mxu0 %v2222_v52  ;;  %231 = vst [vmem:[#allocation2 + $0x1c] sm:$0x1] %v230_v5  ;;  %v234_v6 = vld [vmem:[%s233_s3] sm:$0x1]  ;;  %s241_s30 = scalar_lea.vmem [#allocation7], %s1523_s25  ;;  %v294_v59 = vsub.s32 1, %v2321_v53 }
  0x7b   :  { %235 = vst [vmem:[#allocation2 + $0x1d] sm:$0x1] %v234_v6  ;;  %v238_v7 = vld [vmem:[%s237_s0] sm:$0x1]  ;;  %v2267_v11 = vld [vmem:[#allocation10 + $0x30] ss:$12 sps:$4 sm:$0xff]  }
  0x7c   :  { %239 = vst [vmem:[#allocation2 + $0x1e] sm:$0x1] %v238_v7  ;;  %v242_v9 = vld [vmem:[%s241_s30] sm:$0x1]  ;;  %v246_v12 = vld [vmem:[#allocation2 + $0x10] sm:$0xff]  ;;  %v298_v7 = vsub.s32 2, %v2321_v53 }
  0x7d   :  { %707 = vmatpush1.bf16.msra.mxu0 %v2235_v56  ;;  %243 = vst [vmem:[#allocation2 + $0x1f] sm:$0x1] %v242_v9  ;;  %v2265_v10 = vld [vmem:[#allocation10 + $0x34] ss:$12 sps:$4 sm:$0xff]   ;;  %v2271_v13 = vld [vmem:[#allocation10 + $0x1c] ss:$12 sps:$4 sm:$0xff]  }
  0x7e   :  { %708 = vmatprep.subr.bf16.mxu0 %v2240_v58  ;;  %v250_v14 = vmax.f32 %v246_v12, 0.0  ;;  %v2273_v15 = vld [vmem:[#allocation10 + $0x18] ss:$12 sps:$4 sm:$0xff]   ;;  %v1835_v17 = vld [vmem:[#allocation10 + $0xb0] ss:$12 sps:$4 sm:$0xff]  }
  0x7f   :  { %v2276_v18 = vld [vmem:[#allocation10 + $0x4] ss:$12 sps:$4 sm:$0xff]   ;;  %v2279_v20 = vld [vmem:[#allocation10] ss:$12 sps:$4 sm:$0xff]   ;;  %v1841_v26 = vld [vmem:[#allocation10 + $0x68] ss:$12 sps:$4 sm:$0xff]  }
  0x80   :  { %v1839_v22 = vld [vmem:[#allocation10 + $0x98] ss:$12 sps:$4 sm:$0xff]   ;;  %v1840_v25 = vld [vmem:[#allocation10 + $0x80] ss:$12 sps:$4 sm:$0xff]   ;;  %v1842_v27 = vld [vmem:[#allocation10 + $0x50] ss:$12 sps:$4 sm:$0xff]  }
  0x81   :  { %709 = vmatpush1.bf16.msra.mxu0 %v2253_v1  ;;  %v2286_v23 = vld [vmem:[%s2494_s2] sm:$0xff]  ;;  %v1845_v30 = vld [vmem:[#allocation10 + $0x8] ss:$12 sps:$4 sm:$0xff]   ;;  %v1846_v32 = vld [vmem:[#allocation11 + $0x70] ss:$8 sps:$4 sm:$0xff]  }
  0x82   :  { %710 = vmatprep.subr.bf16.mxu0 %v2257_v4  ;;  %v541_v24 = vpack.c.bf16 %v2286_v23, %v2286_v23  ;;  %v1843_v28 = vld [vmem:[#allocation10 + $0x38] ss:$12 sps:$4 sm:$0xff]   ;;  %v1844_v29 = vld [vmem:[#allocation10 + $0x20] ss:$12 sps:$4 sm:$0xff]   ;;  %v1848_v31 = vld [vmem:[#allocation11 + $0x74] ss:$8 sps:$4 sm:$0xff]  }
  0x83   :  { %v1851_v33 = vld [vmem:[#allocation11 + $0x64] ss:$8 sps:$4 sm:$0xff]   ;;  %v1849_v35 = vld [vmem:[#allocation11 + $0x60] ss:$8 sps:$4 sm:$0xff]   ;;  %v1854_v36 = vld [vmem:[#allocation11 + $0x54] ss:$8 sps:$4 sm:$0xff]  }
  0x84   :  { %v247_v16 = vld [vmem:[#allocation2 + $0x18] sm:$0xff]  ;;  %v1857_v38 = vld [vmem:[#allocation11 + $0x44] ss:$8 sps:$4 sm:$0xff]   ;;  %v1855_v39 = vld [vmem:[#allocation11 + $0x40] ss:$8 sps:$4 sm:$0xff]  }
  0x85   :  { %711 = vmatpush1.bf16.msra.mxu0 %v2262_v8  ;;  %v251_v19 = vmax.f32 %v247_v16, 0.0  ;;  %v1852_v37 = vld [vmem:[#allocation11 + $0x50] ss:$8 sps:$4 sm:$0xff]   ;;  %v1860_v40 = vld [vmem:[#allocation11 + $0x34] ss:$8 sps:$4 sm:$0xff]  }
  0x86   :  { %712 = vmatprep.subr.bf16.mxu0 %v2265_v10  ;;  %v1858_v41 = vld [vmem:[#allocation11 + $0x30] ss:$8 sps:$4 sm:$0xff]   ;;  %v1863_v42 = vld [vmem:[#allocation11 + $0x24] ss:$8 sps:$4 sm:$0xff]   ;;  %v1861_v43 = vld [vmem:[#allocation11 + $0x20] ss:$8 sps:$4 sm:$0xff]  }
  0x87   :  { %v253_v21 = vpack.c.bf16 %v251_v19, %v250_v14  ;;  %v1866_v45 = vld [vmem:[#allocation11 + $0x14] ss:$8 sps:$4 sm:$0xff]   ;;  %v1864_v47 = vld [vmem:[#allocation11 + $0x10] ss:$8 sps:$4 sm:$0xff]   ;;  %v1869_v48 = vld [vmem:[#allocation11 + $0x4] ss:$8 sps:$4 sm:$0xff]  }
  0x88   :  { %v1867_v49 = vld [vmem:[#allocation11] ss:$8 sps:$4 sm:$0xff]  }
  0x89   :  { %713 = vmatpush1.bf16.msra.mxu0 %v2267_v11  ;;  %1684 = vmatmul.mubr.bf16.vlgmr.msra.gmra.mxu1 %v253_v21  ;;  %v286_v55 = vld [vmem:[%s2497_s5] sm:$0x7] }
  0x8a   :  { %714 = vmatprep.subr.bf16.mxu0 %v2271_v13  ;;  %474 = vmatmul.mubr.bf16.gmra.mxu0 %v253_v21  ;;  %v291_v62 = vrot.slane %v286_v55, %v290_v54  ;;  %v295_v0 = vrot.slane %v286_v55, %v294_v59  ;;  %v299_v9 = vrot.slane %v286_v55, %v298_v7  ;;  %v2354_v51 = vld [vmem:[%s2498_s6] ss:$0 sm:$0xff]  ;;  %s2095_s6 = smov [#allocation14]  }
  0x8b   :  { %1688 = vmatpush3.bf16.msra.mxu1 %v1835_v17  ;;  %734 = vmatprep.mubr.bf16.mxu0 %v2092_v2  ;;  %s1435_s7 = sshll.u32 %s2095_s6, 4  ;;  %s1436_s7 = int_to_ptr.vmem [resolvable:$true] %s1435_s7 }
  0x8c   :  { %1689 = vmatprep.subr.bf16.mxu1 %v2093_v60  ;;  %1703 = vmatprep.mubr.msk.bf16.mxu1 %vm2094_vm0, %v2093_v60  ;;  %s2030_s15 = scalar_lea.vmem %s1436_s7, 256  ;;  %p2035_p3 = scmp.lt.s32.totalorder %s1436_s7, %s1436_s7 }
  0x8d   :  { %715 = vmatpush1.bf16.msra.mxu0 %v2273_v15  ;;  %p2031_p2 = scmp.ne.s32.totalorder %s1436_s7, %s2030_s15  ;;  %p2036_p4 = scmp.lt.s32.totalorder %s2030_s15, %s2030_s15 }
  0x8e   :  { %716 = vmatprep.subr.bf16.mxu0 %v2276_v18 }
  0x8f   :  { %1690 = vmatpush3.bf16.msra.mxu1 %v1839_v22  ;;  %p2037_p5 = por %p2036_p4, %p2035_p3 }
  0x90   :  { %1691 = vmatprep.subr.bf16.mxu1 %v2093_v60 }
  0x91   :  { %717 = vmatpush1.bf16.msra.mxu0 %v2279_v20  ;;  %p2038_p6 = pnand %p2037_p5, %p2031_p2 }
  0x92   :  { %914 = vmatprep.subr.bf16.mxu0 %v1848_v31 }
  0x93   :  { %1692 = vmatpush3.bf16.msra.mxu1 %v1840_v25 }
  0x94   :  { %735 = vmatmul.mubr.bf16.vlgmr.msra.gmra.mxu0 %v541_v24  ;;  %1693 = vmatprep.subr.bf16.mxu1 %v2093_v60 }
  0x95   :  { %946 = vmatprep.mubr.bf16.mxu0 %v2092_v2  ;;  %915 = vmatpush1.bf16.msra.mxu0 %v1846_v32 }
  0x96   :  { %916 = vmatprep.subr.bf16.mxu0 %v1851_v33 }
  0x97   :  { %1694 = vmatpush3.bf16.msra.mxu1 %v1841_v26 }
  0x98   :  { %1695 = vmatprep.subr.bf16.mxu1 %v2093_v60 }
  0x99   :  { %917 = vmatpush1.bf16.msra.mxu0 %v1849_v35 }
  0x9a   :  { %918 = vmatprep.subr.bf16.mxu0 %v1854_v36 }
  0x9b   :  { %1696 = vmatpush3.bf16.msra.mxu1 %v1842_v27 }
  0x9c   :  { %1697 = vmatprep.subr.bf16.mxu1 %v2093_v60 }
  0x9d   :  { %919 = vmatpush1.bf16.msra.mxu0 %v1852_v37 }
  0x9e   :  { %920 = vmatprep.subr.bf16.mxu0 %v1857_v38 }
  0x9f   :  { %1698 = vmatpush3.bf16.msra.mxu1 %v1843_v28 }
  0xa0   :  { %1699 = vmatprep.subr.bf16.mxu1 %v2093_v60 }
  0xa1   :  { %921 = vmatpush1.bf16.msra.mxu0 %v1855_v39 }
  0xa2   :  { %922 = vmatprep.subr.bf16.mxu0 %v1860_v40 }
  0xa3   :  { %1700 = vmatpush3.bf16.msra.mxu1 %v1844_v29 }
  0xa4   :  { %1701 = vmatprep.subr.bf16.mxu1 %v2093_v60 }
  0xa5   :  { %923 = vmatpush1.bf16.msra.mxu0 %v1858_v41 }
  0xa6   :  { %924 = vmatprep.subr.bf16.mxu0 %v1863_v42 }
  0xa7   :  { %1702 = vmatpush3.bf16.msra.mxu1 %v1845_v30 }
  0xa8   :  { %1117 = vmatprep.subr.bf16.mxu1 %v2198_v34 }
  0xa9   :  { %925 = vmatpush1.bf16.msra.mxu0 %v1861_v43 }
  0xaa   :  { %1704 = vmatmul.mubr.bf16.vlgmr.msra.gmra.mxu1 %v541_v24  ;;  %926 = vmatprep.subr.bf16.mxu0 %v1866_v45 }
  0xab   :  { %1118 = vmatpush1.bf16.msra.mxu1 %v2206_v44  ;;  %1149 = vmatprep.mubr.bf16.mxu1 %v2092_v2 }
  0xac   :  { %1119 = vmatprep.subr.bf16.mxu1 %v2210_v46 }
  0xad   :  { %927 = vmatpush1.bf16.msra.mxu0 %v1864_v47 }
  0xae   :  { %928 = vmatprep.subr.bf16.mxu0 %v1869_v48 }
  0xaf   :  { %1120 = vmatpush1.bf16.msra.mxu1 %v2218_v50 }
  0xb0   :  { %1121 = vmatprep.subr.bf16.mxu1 %v2222_v52 }
  0xb1   :  { %929 = vmatpush1.bf16.msra.mxu0 %v1867_v49 }
  0xb2   :  { %1707 = vmatprep.subr.bf16.mxu0 %v2093_v60 }
  0xb3   :  { %1122 = vmatpush1.bf16.msra.mxu1 %v2235_v56 }
  0xb4   :  { %1123 = vmatprep.subr.bf16.mxu1 %v2240_v58 }
  0xb7   :  { %1124 = vmatpush1.bf16.msra.mxu1 %v2253_v1 }
  0xb8   :  { %1125 = vmatprep.subr.bf16.mxu1 %v2257_v4 }
  0xbb   :  { %1126 = vmatpush1.bf16.msra.mxu1 %v2262_v8 }
  0xbc   :  { %1127 = vmatprep.subr.bf16.mxu1 %v2265_v10 }
  0xbf   :  { %1128 = vmatpush1.bf16.msra.mxu1 %v2267_v11 }
  0xc0   :  { %1129 = vmatprep.subr.bf16.mxu1 %v2271_v13 }
  0xc3   :  { %1130 = vmatpush1.bf16.msra.mxu1 %v2273_v15 }
  0xc4   :  { %1131 = vmatprep.subr.bf16.mxu1 %v2276_v18 }
  0xc7   :  { %1132 = vmatpush1.bf16.msra.mxu1 %v2279_v20 }
  0xc8   :  { %1221 = vmatprep.subr.bf16.mxu1 %v2198_v34 }
 0x134   :  { %v465_v57 = vpop.f32.mrf.mxu0 }
 0x135   :  { %v466_v30 = vadd.f32 %v465_v57, %v291_v62 }
 0x136   :  { %v467_v61 = vpop.f32.mrf.mxu0 }
 0x137   :  { %v468_v39 = vadd.f32 %v467_v61, %v295_v0 }
 0x138   :  { %v469_v63 = vpop.f32.mrf.mxu0 }
 0x139   :  { %v2332_v3 = vadd.f32 %v469_v63, %v291_v62 }
 0x13a   :  { %v471_v5 = vpop.f32.mrf.mxu0 }
 0x13b   :  { %v2334_v6 = vadd.f32 %v471_v5, %v295_v0 }
 0x149   :  { %v1685_v14 = vpop.f32.mrf.mxu1 }
 0x14a   :  { %v475_v12 = vpop.f32.mrf.mxu0  ;;  %v2339_v17 = vadd.f32 %v1685_v14, %v299_v9 }
 0x14b   :  { %v2337_v16 = vadd.f32 %v475_v12, %v291_v62  ;;  %v518_v21 = vpop.f32.mrf.mxu1 }
 0x14c   :  { %v477_v19 = vpop.f32.mrf.mxu0 }
 0x14d   :  { %v2341_v22 = vadd.f32 %v477_v19, %v295_v0  ;;  %v1686_v25 = vpop.f32.mrf.mxu1 }
 0x14e   :  { %v479_v24 = vpop.f32.mrf.mxu0  ;;  %v2345_v27 = vadd.f32 %v1686_v25, %v299_v9 }
 0x14f   :  { %v2343_v26 = vadd.f32 %v479_v24, %v291_v62  ;;  %v521_v29 = vpop.f32.mrf.mxu1 }
 0x150   :  { %v481_v28 = vpop.f32.mrf.mxu0  ;;  %v2349_v32 = vadd.f32 %v521_v29, %v299_v9  ;;  %v2360_v29 = vld [vmem:[#allocation10 + $0xb0] ss:$12 sps:$4 sm:$0xff]  }
 0x151   :  { %v2347_v31 = vadd.f32 %v481_v28, %v295_v0  ;;  %v519_v0 = vadd.f32 %v518_v21, %v299_v9  ;;  %v2365_v9 = vld [vmem:[#allocation10 + $0x98] ss:$12 sps:$4 sm:$0xff]   ;;  %v2380_v21 = vld [vmem:[#allocation10 + $0x68] ss:$12 sps:$4 sm:$0xff]  }
 0x154   :  { %v736_v33 = vpop.f32.mrf.mxu0 }
 0x155   :  { %v783_v35 = vadd.f32 %v736_v33, %v466_v30  ;;  %v2386_v33 = vld [vmem:[#allocation10 + $0x50] ss:$12 sps:$4 sm:$0xff]  }
 0x156   :  { %v738_v36 = vpop.f32.mrf.mxu0 }
 0x157   :  { %v1573_v37 = vmul.f32 -1.442695, %v783_v35  ;;  %v790_v41 = vadd.f32 %v738_v36, %v468_v39  ;;  %v2392_v35 = vld [vmem:[#allocation10 + $0x38] ss:$12 sps:$4 sm:$0xff]   ;;  %v2398_v36 = vld [vmem:[#allocation10 + $0x20] ss:$12 sps:$4 sm:$0xff]  }
 0x158   :  { %v740_v38 = vpop.f32.mrf.mxu0 }
 0x159   :  { %1878 = vpow2.f32 %v1573_v37  ;;  %v1574_v42 = vmul.f32 -1.442695, %v790_v41  ;;  %v2404_v37 = vld [vmem:[#allocation10 + $0x8] ss:$12 sps:$4 sm:$0xff]  }
 0x15a   :  { %v741_v40 = vpop.f32.mrf.mxu0 }
 0x15b   :  { %1880 = vpow2.f32 %v1574_v42 }
 0x166   :  { %v1879_v43 = vpop.eup %1878 }
 0x167   :  { %v787_v45 = vadd.f32 1.0, %v1879_v43 }
 0x168   :  { %v1881_v49 = vpop.eup %1880 }
 0x169   :  { %1882 = vrcp.f32 %v787_v45  ;;  %v794_v62 = vadd.f32 1.0, %v1881_v49 }
 0x16a   :  { %v777_v47 = vpop.f32.mrf.mxu1 }
 0x16b   :  { %v797_v61 = vadd.f32 %v2354_v51, %v777_v47  ;;  %1884 = vrcp.f32 %v794_v62 }
 0x16c   :  { %v1705_v48 = vpop.f32.mrf.mxu1 }
 0x16e   :  { %v780_v55 = vpop.f32.mrf.mxu1 }
 0x170   :  { %v1706_v57 = vpop.f32.mrf.mxu1 }
 0x176   :  { %v1883_v63 = vpop.eup %1882 }
 0x177   :  { %v798_v5 = vmul.f32 %v1883_v63, %v797_v61 }
 0x178   :  { %v1885_v12 = vpop.eup %1884 }
 0x179   :  { %v799_v7 = vadd.f32 %v798_v5, %v519_v0  ;;  %v801_v14 = vsub.f32 1.0, %v1885_v12  ;;  %v803_v25 = vmul.f32 %v1885_v12, %v2286_v23  ;;  %v2374_v23 = vld [vmem:[#allocation10 + $0x80] ss:$12 sps:$4 sm:$0xff]  }
 0x17b   :  { %1886 = vtanh.f32 %v799_v7 }
 0x188   :  { %v1887_v19 = vpop.eup %1886 }
 0x189   :  { %v802_v24 = vmul.f32 %v1887_v19, %v801_v14 }
 0x18b   :  { %v2358_v28 = vadd.f32 %v803_v25, %v802_v24 }
 0x18d   :  { %v805_v30 = vpack.c.bf16 %v2358_v28, %v2358_v28 }
 0x18f   :  { %947 = vmatmul.mubr.bf16.vlgmr.msra.gmra.mxu0 %v805_v30  ;;  %1150 = vmatmul.mubr.bf16.vlgmr.msra.gmra.mxu1 %v805_v30 }
 0x190   :  { %1708 = vmatpush3.bf16.msra.mxu0 %v2360_v29  ;;  %1723 = vmatprep.mubr.msk.bf16.mxu0 %vm2094_vm0, %v2093_v60 }
 0x191   :  { %1709 = vmatprep.subr.bf16.mxu0 %v2093_v60  ;;  %1222 = vmatpush1.bf16.msra.mxu1 %v2206_v44 }
 0x192   :  { %1223 = vmatprep.subr.bf16.mxu1 %v2210_v46  ;;  %1253 = vmatprep.mubr.bf16.mxu1 %v2092_v2 }
 0x194   :  { %1710 = vmatpush3.bf16.msra.mxu0 %v2365_v9 }
 0x195   :  { %1711 = vmatprep.subr.bf16.mxu0 %v2093_v60  ;;  %1224 = vmatpush1.bf16.msra.mxu1 %v2218_v50 }
 0x196   :  { %1225 = vmatprep.subr.bf16.mxu1 %v2222_v52 }
 0x198   :  { %1712 = vmatpush3.bf16.msra.mxu0 %v2374_v23 }
 0x199   :  { %1713 = vmatprep.subr.bf16.mxu0 %v2093_v60  ;;  %1226 = vmatpush1.bf16.msra.mxu1 %v2235_v56 }
 0x19a   :  { %1227 = vmatprep.subr.bf16.mxu1 %v2240_v58 }
 0x19c   :  { %1714 = vmatpush3.bf16.msra.mxu0 %v2380_v21 }
 0x19d   :  { %1715 = vmatprep.subr.bf16.mxu0 %v2093_v60  ;;  %1228 = vmatpush1.bf16.msra.mxu1 %v2253_v1 }
 0x19e   :  { %1229 = vmatprep.subr.bf16.mxu1 %v2257_v4 }
 0x1a0   :  { %1716 = vmatpush3.bf16.msra.mxu0 %v2386_v33 }
 0x1a1   :  { %1717 = vmatprep.subr.bf16.mxu0 %v2093_v60  ;;  %1230 = vmatpush1.bf16.msra.mxu1 %v2262_v8 }
 0x1a2   :  { %1231 = vmatprep.subr.bf16.mxu1 %v2265_v10 }
 0x1a4   :  { %1718 = vmatpush3.bf16.msra.mxu0 %v2392_v35 }
 0x1a5   :  { %1719 = vmatprep.subr.bf16.mxu0 %v2093_v60  ;;  %1232 = vmatpush1.bf16.msra.mxu1 %v2267_v11 }
 0x1a6   :  { %1233 = vmatprep.subr.bf16.mxu1 %v2271_v13 }
 0x1a8   :  { %1720 = vmatpush3.bf16.msra.mxu0 %v2398_v36 }
 0x1a9   :  { %1721 = vmatprep.subr.bf16.mxu0 %v2093_v60  ;;  %1234 = vmatpush1.bf16.msra.mxu1 %v2273_v15 }
 0x1aa   :  { %1235 = vmatprep.subr.bf16.mxu1 %v2276_v18 }
 0x1ac   :  { %1722 = vmatpush3.bf16.msra.mxu0 %v2404_v37 }
 0x1ad   :  { %1727 = vmatprep.subr.bf16.mxu0 %v2093_v60  ;;  %1236 = vmatpush1.bf16.msra.mxu1 %v2279_v20 }
 0x1ae   :  { %1325 = vmatprep.subr.bf16.mxu1 %v2198_v34  ;;  %v822_v34 = vld [vmem:[#allocation13] sm:$0x3] }
 0x1af   :  { %1724 = vmatmul.mubr.bf16.vlgmr.msra.gmra.mxu0 %v805_v30  ;;  %v827_v38 = vrot.slane %v822_v34, %v290_v54  ;;  %v831_v39 = vrot.slane %v822_v34, %v294_v59 }
 0x1b0   :  { %1728 = vmatpush3.bf16.msra.mxu0 %v2360_v29  ;;  %1743 = vmatprep.mubr.msk.bf16.mxu0 %vm2094_vm0, %v2093_v60 }
 0x1b1   :  { %1729 = vmatprep.subr.bf16.mxu0 %v2093_v60 }
 0x1b4   :  { %1730 = vmatpush3.bf16.msra.mxu0 %v2365_v9 }
 0x1b5   :  { %1731 = vmatprep.subr.bf16.mxu0 %v2093_v60 }
 0x1b8   :  { %1732 = vmatpush3.bf16.msra.mxu0 %v2374_v23 }
 0x1b9   :  { %1733 = vmatprep.subr.bf16.mxu0 %v2093_v60 }
 0x1bc   :  { %1734 = vmatpush3.bf16.msra.mxu0 %v2380_v21 }
 0x1bd   :  { %1735 = vmatprep.subr.bf16.mxu0 %v2093_v60 }
 0x1c0   :  { %1736 = vmatpush3.bf16.msra.mxu0 %v2386_v33 }
 0x1c1   :  { %1737 = vmatprep.subr.bf16.mxu0 %v2093_v60 }
 0x1c4   :  { %1738 = vmatpush3.bf16.msra.mxu0 %v2392_v35 }
 0x1c5   :  { %1739 = vmatprep.subr.bf16.mxu0 %v2093_v60 }
 0x1c8   :  { %1740 = vmatpush3.bf16.msra.mxu0 %v2398_v36 }
 0x1c9   :  { %1741 = vmatprep.subr.bf16.mxu0 %v2093_v60 }
 0x1cc   :  { %1742 = vmatpush3.bf16.msra.mxu0 %v2404_v37 }
 0x1cd   :  { %1747 = vmatprep.subr.bf16.mxu0 %v2093_v60 }
 0x24f   :  { %v948_v40 = vpop.f32.mrf.mxu0  ;;  %v1151_v41 = vpop.f32.mrf.mxu1 }
 0x250   :  { %v949_v42 = vadd.f32 %v948_v40, %v827_v38  ;;  %v1198_v43 = vadd.f32 %v1151_v41, %v2332_v3 }
 0x251   :  { %v950_v45 = vpop.f32.mrf.mxu0  ;;  %v1153_v47 = vpop.f32.mrf.mxu1 }
 0x252   :  { %955 = vst [vmem:[#allocation14] sm:$0xff] %v949_v42  ;;  %v1615_v48 = vmul.f32 -1.442695, %v1198_v43  ;;  %v951_v49 = vadd.f32 %v950_v45, %v831_v39  ;;  %v1205_v54 = vadd.f32 %v1153_v47, %v2334_v6 }
 0x253   :  { %v952_v55 = vpop.f32.mrf.mxu0  ;;  %v1155_v57 = vpop.f32.mrf.mxu1 }
 0x254   :  { %1888 = vpow2.f32 %v1615_v48  ;;  %956 = vst [vmem:[#allocation14 + $0x8] sm:$0xff] %v951_v49  ;;  %v1616_v53 = vmul.f32 -1.442695, %v1205_v54 }
 0x255   :  { %v953_v62 = vpop.f32.mrf.mxu0  ;;  %v1156_v61 = vpop.f32.mrf.mxu1 }
 0x256   :  { %1890 = vpow2.f32 %v1616_v53 }
 0x261   :  { %v1889_v59 = vpop.eup %1888 }
 0x262   :  { %v1202_v63 = vadd.f32 1.0, %v1889_v59 }
 0x263   :  { %v1891_v0 = vpop.eup %1890 }
 0x264   :  { %1892 = vrcp.f32 %v1202_v63  ;;  %v1209_v3 = vadd.f32 1.0, %v1891_v0 }
 0x266   :  { %1894 = vrcp.f32 %v1209_v3 }
 0x26f   :  { %v1192_v5 = vpop.f32.mrf.mxu0 }
 0x270   :  { %v1212_v7 = vadd.f32 %v2354_v51, %v1192_v5 }
 0x271   :  { %v1893_v12 = vpop.eup %1892  ;;  %v1725_v14 = vpop.f32.mrf.mxu0 }
 0x272   :  { %v1213_v19 = vmul.f32 %v1893_v12, %v1212_v7 }
 0x273   :  { %v1195_v24 = vpop.f32.mrf.mxu0  ;;  %v1895_v6 = vpop.eup %1894 }
 0x274   :  { %v1214_v25 = vadd.f32 %v1213_v19, %v2349_v32  ;;  %v1216_v34 = vsub.f32 1.0, %v1895_v6  ;;  %v1218_v40 = vmul.f32 %v1895_v6, %v2358_v28 }
 0x275   :  { %v1726_v30 = vpop.f32.mrf.mxu0 }
 0x276   :  { %1896 = vtanh.f32 %v1214_v25 }
 0x283   :  { %v1897_v38 = vpop.eup %1896 }
 0x284   :  { %v1217_v39 = vmul.f32 %v1897_v38, %v1216_v34 }
 0x286   :  { %v2440_v41 = vadd.f32 %v1218_v40, %v1217_v39 }
 0x288   :  { %v1220_v42 = vpack.c.bf16 %v2440_v41, %v2440_v41 }
 0x28a   :  { %1254 = vmatmul.mubr.bf16.vlgmr.msra.gmra.mxu1 %v1220_v42  ;;  %1744 = vmatmul.mubr.bf16.vlgmr.msra.gmra.mxu0 %v1220_v42 }
 0x28b   :  { %1326 = vmatpush1.bf16.msra.mxu1 %v2206_v44  ;;  %1748 = vmatpush3.bf16.msra.mxu0 %v2360_v29 }
 0x28c   :  { %1327 = vmatprep.subr.bf16.mxu1 %v2210_v46  ;;  %1749 = vmatprep.subr.bf16.mxu0 %v2093_v60 }
 0x28d   :  { %1357 = vmatprep.mubr.bf16.mxu1 %v2092_v2  ;;  %1763 = vmatprep.mubr.msk.bf16.mxu0 %vm2094_vm0, %v2093_v60 }
 0x28f   :  { %1328 = vmatpush1.bf16.msra.mxu1 %v2218_v50  ;;  %1750 = vmatpush3.bf16.msra.mxu0 %v2365_v9 }
 0x290   :  { %1329 = vmatprep.subr.bf16.mxu1 %v2222_v52  ;;  %1751 = vmatprep.subr.bf16.mxu0 %v2093_v60 }
 0x293   :  { %1330 = vmatpush1.bf16.msra.mxu1 %v2235_v56  ;;  %1752 = vmatpush3.bf16.msra.mxu0 %v2374_v23 }
 0x294   :  { %1331 = vmatprep.subr.bf16.mxu1 %v2240_v58  ;;  %1753 = vmatprep.subr.bf16.mxu0 %v2093_v60 }
 0x297   :  { %1332 = vmatpush1.bf16.msra.mxu1 %v2253_v1  ;;  %1754 = vmatpush3.bf16.msra.mxu0 %v2380_v21 }
 0x298   :  { %1333 = vmatprep.subr.bf16.mxu1 %v2257_v4  ;;  %1755 = vmatprep.subr.bf16.mxu0 %v2093_v60 }
 0x29b   :  { %1334 = vmatpush1.bf16.msra.mxu1 %v2262_v8  ;;  %1756 = vmatpush3.bf16.msra.mxu0 %v2386_v33 }
 0x29c   :  { %1335 = vmatprep.subr.bf16.mxu1 %v2265_v10  ;;  %1757 = vmatprep.subr.bf16.mxu0 %v2093_v60 }
 0x29f   :  { %1336 = vmatpush1.bf16.msra.mxu1 %v2267_v11  ;;  %1758 = vmatpush3.bf16.msra.mxu0 %v2392_v35 }
 0x2a0   :  { %1337 = vmatprep.subr.bf16.mxu1 %v2271_v13  ;;  %1759 = vmatprep.subr.bf16.mxu0 %v2093_v60 }
 0x2a3   :  { %1338 = vmatpush1.bf16.msra.mxu1 %v2273_v15  ;;  %1760 = vmatpush3.bf16.msra.mxu0 %v2398_v36 }
 0x2a4   :  { %1339 = vmatprep.subr.bf16.mxu1 %v2276_v18  ;;  %1761 = vmatprep.subr.bf16.mxu0 %v2093_v60 }
 0x2a7   :  { %1340 = vmatpush1.bf16.msra.mxu1 %v2279_v20  ;;  %1762 = vmatpush3.bf16.msra.mxu0 %v2404_v37 }
 0x34a   :  { %v1255_v2 = vpop.f32.mrf.mxu1  ;;  %v1296_v44 = vpop.f32.mrf.mxu0 }
 0x34b   :  { %v1302_v46 = vadd.f32 %v1255_v2, %v2337_v16  ;;  %v1316_v20 = vadd.f32 %v2354_v51, %v1296_v44 }
 0x34c   :  { %v1257_v50 = vpop.f32.mrf.mxu1  ;;  %v1745_v52 = vpop.f32.mrf.mxu0 }
 0x34d   :  { %v1617_v56 = vmul.f32 -1.442695, %v1302_v46  ;;  %v1309_v10 = vadd.f32 %v1257_v50, %v2341_v22 }
 0x34e   :  { %v1259_v58 = vpop.f32.mrf.mxu1  ;;  %v1299_v1 = vpop.f32.mrf.mxu0 }
 0x34f   :  { %1898 = vpow2.f32 %v1617_v56  ;;  %v1618_v11 = vmul.f32 -1.442695, %v1309_v10 }
 0x350   :  { %v1260_v4 = vpop.f32.mrf.mxu1  ;;  %v1746_v8 = vpop.f32.mrf.mxu0 }
 0x351   :  { %1900 = vpow2.f32 %v1618_v11 }
 0x35c   :  { %v1899_v60 = vpop.eup %1898 }
 0x35d   :  { %v1306_v13 = vadd.f32 1.0, %v1899_v60 }
 0x35e   :  { %v1901_v15 = vpop.eup %1900 }
 0x35f   :  { %1902 = vrcp.f32 %v1306_v13  ;;  %v1313_v18 = vadd.f32 1.0, %v1901_v15 }
 0x361   :  { %1904 = vrcp.f32 %v1313_v18 }
 0x36c   :  { %v1903_v16 = vpop.eup %1902 }
 0x36d   :  { %v1317_v32 = vmul.f32 %v1903_v16, %v1316_v20 }
 0x36e   :  { %v1905_v29 = vpop.eup %1904 }
 0x36f   :  { %v1318_v28 = vadd.f32 %v1317_v32, %v2339_v17  ;;  %v1320_v9 = vsub.f32 1.0, %v1905_v29  ;;  %v1322_v22 = vmul.f32 %v1905_v29, %v2440_v41 }
 0x371   :  { %1906 = vtanh.f32 %v1318_v28 }
 0x37e   :  { %v1907_v23 = vpop.eup %1906 }
 0x37f   :  { %v1321_v21 = vmul.f32 %v1907_v23, %v1320_v9 }
 0x381   :  { %v1323_v33 = vadd.f32 %v1322_v22, %v1321_v21 }
 0x383   :  { %v1324_v35 = vpack.c.bf16 %v1323_v33, %v1323_v33 }
 0x385   :  { %1358 = vmatmul.mubr.bf16.vlgmr.msra.gmra.mxu1 %v1324_v35  ;;  %1764 = vmatmul.mubr.bf16.vlgmr.msra.gmra.mxu0 %v1324_v35 }
 0x386   :  { %2041 = shalt.err (!%p2038_p6)
}
 0x387   :  { %1438 = dma.vmem_to_hbm [thread:$0]  %s1436_s7, 256, %s2501_s9, [#allocation5]  }
 0x388   :  { %s2096_s9 = smov [#allocation15]  }
 0x389   :  { %s1445_s20 = sshll.u32 %s2096_s9, 4  ;;  %s1446_s20 = int_to_ptr.vmem [resolvable:$true] %s1445_s20 }
 0x38a   :  { %s2050_s21 = scalar_lea.vmem %s1446_s20, 128  ;;  %p2055_p8 = scmp.lt.s32.totalorder %s1446_s20, %s1446_s20 }
 0x38b   :  { %p2051_p7 = scmp.ne.s32.totalorder %s1446_s20, %s2050_s21  ;;  %p2056_p9 = scmp.lt.s32.totalorder %s2050_s21, %s2050_s21 }
 0x38d   :  { %p2057_p10 = por %p2056_p9, %p2055_p8 }
 0x38f   :  { %p2058_p11 = pnand %p2057_p10, %p2051_p7 }
 0x445   :  { %v1359_v17 = vpop.f32.mrf.mxu1  ;;  %v1400_v36 = vpop.f32.mrf.mxu0 }
 0x446   :  { %v1406_v37 = vadd.f32 %v1359_v17, %v2343_v26  ;;  %v1420_v0 = vadd.f32 %v2354_v51, %v1400_v36 }
 0x447   :  { %v1361_v43 = vpop.f32.mrf.mxu1  ;;  %v1765_v45 = vpop.f32.mrf.mxu0 }
 0x448   :  { %v1619_v47 = vmul.f32 -1.442695, %v1406_v37  ;;  %v1413_v62 = vadd.f32 %v1361_v43, %v2347_v31 }
 0x449   :  { %v1363_v48 = vpop.f32.mrf.mxu1  ;;  %v1403_v49 = vpop.f32.mrf.mxu0 }
 0x44a   :  { %1908 = vpow2.f32 %v1619_v47  ;;  %v1620_v61 = vmul.f32 -1.442695, %v1413_v62 }
 0x44b   :  { %v1364_v55 = vpop.f32.mrf.mxu1  ;;  %v1766_v57 = vpop.f32.mrf.mxu0 }
 0x44c   :  { %1910 = vpow2.f32 %v1620_v61 }
 0x457   :  { %v1909_v54 = vpop.eup %1908 }
 0x458   :  { %v1410_v53 = vadd.f32 1.0, %v1909_v54 }
 0x459   :  { %v1911_v59 = vpop.eup %1910 }
 0x45a   :  { %1912 = vrcp.f32 %v1410_v53  ;;  %v1417_v63 = vadd.f32 1.0, %v1911_v59 }
 0x45c   :  { %1914 = vrcp.f32 %v1417_v63 }
 0x467   :  { %v1913_v26 = vpop.eup %1912 }
 0x468   :  { %v1421_v3 = vmul.f32 %v1913_v26, %v1420_v0 }
 0x469   :  { %v1915_v7 = vpop.eup %1914 }
 0x46a   :  { %v1422_v5 = vadd.f32 %v1421_v3, %v2345_v27  ;;  %v1424_v12 = vsub.f32 1.0, %v1915_v7  ;;  %v1426_v19 = vmul.f32 %v1915_v7, %v1323_v33 }
 0x46c   :  { %1916 = vtanh.f32 %v1422_v5 }
 0x479   :  { %v1917_v14 = vpop.eup %1916 }
 0x47a   :  { %v1425_v31 = vmul.f32 %v1917_v14, %v1424_v12 }
 0x47c   :  { %v1427_v24 = vadd.f32 %v1426_v19, %v1425_v31 }
 0x47e   :  { %1428 = vst [vmem:[#allocation15] sm:$0xff] %v1427_v24 }
 0x47f   :  { %2061 = shalt.err (!%p2058_p11)
}
 0x480   :  { %1448 = dma.vmem_to_hbm [thread:$0]  %s1446_s20, 128, %s2502_s10, [#allocation16]  }
 0x481   :  { %2078 = dma.done.wait [#allocation5], 256  }
 0x482   :  { %2079 = vsyncadd [#allocation5], 4294967040 }
 0x483   :  { %2080 = dma.done.wait [#allocation16], 128  }
 0x484   :  { %2081 = vsyncadd [#allocation16], 4294967168 }
 0x485   :  { %1455 = vsyncpa [#allocation4], 1 }
 0x486   :  { %1456 = vsyncpa [#allocation9], 1 }
 0x487   :  { %1457 = vsyncpa [#allocation12], 1 }
 0x488   :  { %1458 = vsyncpa [#allocation5], 1 }
 0x489   :  { %1459 = vsyncpa [#allocation16], 1 }
 0x48a   :  { %1460 = vsyncpa [#allocation6], 1 }

</bundles_post_ra>
